<compile_context>
chip_gen: v7x
topology: tpu7x:2x2x1
jax: 0.10.0
libtpu: 0.0.40
codegen_flags: <defaults>
</compile_context>

<pallas_src>
import math
import numpy as np
import jax
import jax.numpy as jnp
from jax.experimental import pallas as pl
from jax.experimental.pallas import tpu as pltpu

# edm_cfg defaults (sampler path)
SIGMA_DATA = 1.0
SIGMA_OFFSET_NOISE = 1.0
SIGMA_MIN = 2e-3
SIGMA_MAX_SAMPLER = 10.0
RHO = 7.0
S_CHURN = 0.0            # -> gamma = 0, no stochastic churn
S_TMIN = 0.0
S_TMAX = float("inf")
NUM_DENOISE_STEPS = 5
ORDER = 1                # Euler


# --------------------------------------------------------------------------
# Fused sampling kernel: all denoising steps in one invocation.
# --------------------------------------------------------------------------
def make_sampler(R, D, n_steps):
    """R = padded_cond_rows + B*Sp stacked rows, D = transition dim."""

    def kernel(coef_ref,                     # SMEM [n_steps*4] f32
               temb_ref,                     # VMEM [n_steps, H] f32
               xs0_ref,                      # VMEM [R, D] f32 (cond_pad + noise)
               mask_ref,                     # VMEM [R, 1] f32 (0 cond, 1 pred)
               win_ref, bin_ref,             # [D, H] bf16, [1, H] f32
               wall_ref,                     # [R, R] bf16 (token mix + select)
               whid_ref, bhid_ref,           # [H, H] bf16, [1, H] f32
               wout_ref, bout_ref,           # [H, D] bf16, [1, D] f32
               xout_ref):                    # out: [R, D] f32
        # Load weights / masks once; reused by every unrolled step.
        mask = mask_ref[...]
        win = win_ref[...]
        wall = wall_ref[...]
        whid = whid_ref[...]
        wout = wout_ref[...]
        b_in = bin_ref[...]
        b_hid = bhid_ref[...]
        b_out = bout_ref[...]

        def euler_step(step, xs):
            # Host-precomputed EDM scalars for this step (flat SMEM table).
            c_in = coef_ref[step * 4 + 0]
            c_skip = coef_ref[step * 4 + 1]
            c_out = coef_ref[step * 4 + 2]
            dt_over_sh = coef_ref[step * 4 + 3]   # (next_sigma - sigma_hat)/sigma_hat
            temb = temb_ref[pl.ds(step, 1), :]    # [1, H] time embedding

            # Per-row scale: 1 for cond rows (already /sigma_data on host),
            # c_in for predicted rows -> single fused input-projection matmul.
            scale = 1.0 + mask * (c_in - 1.0)
            xin = (xs * scale).astype(jnp.bfloat16)
            h = jax.nn.gelu(
                jnp.dot(xin, win, preferred_element_type=jnp.float32)
                + b_in + temb)                                       # [R, H] f32
            # Residual token mixing + "keep last Sp tokens", folded on the host
            # into one block-diagonal matrix -> a single MXU contraction.
            h_mix = jnp.dot(wall, h.astype(jnp.bfloat16),
                            preferred_element_type=jnp.float32)      # [R, H]
            h2 = jax.nn.gelu(
                jnp.dot(h_mix.astype(jnp.bfloat16), whid,
                        preferred_element_type=jnp.float32) + b_hid) # [R, H]
            model_out = jnp.dot(h2.astype(jnp.bfloat16), wout,
                                preferred_element_type=jnp.float32) + b_out

            # EDM preconditioning + order-1 (Euler) ODE update, all f32.
            # Cond / pad rows are frozen by the mask (their "denoised" is junk
            # but multiplied by 0).
            denoised = model_out * c_out + xs * c_skip
            return xs + (xs - denoised) * (dt_over_sh * mask)

        # TODO(synk): stochastic churn (s_churn>0) noise injection has no
        # in-kernel path; default config uses s_churn=0 so sigma_hat==sigma.
        xs_final = jax.lax.fori_loop(0, n_steps, euler_step, xs0_ref[...],
                                     unroll=True)
        xout_ref[...] = xs_final               # single HBM writeback

    vmem = pl.BlockSpec(memory_space=pltpu.MemorySpace.VMEM)
    smem = pl.BlockSpec(memory_space=pltpu.MemorySpace.SMEM)

    sampler = pl.pallas_call(
        kernel,
        out_shape=jax.ShapeDtypeStruct((R, D), jnp.float32),
        in_specs=[smem] + [vmem] * 10,
        out_specs=vmem,
    )
    return jax.jit(sampler)


# --------------------------------------------------------------------------
# Host-side precomputation (sigma schedule is host-known)
# --------------------------------------------------------------------------
def build_sigma(denoise_steps, sigma_min, sigma_max, rho):
    min_inv_rho = sigma_min ** (1.0 / rho)
    max_inv_rho = sigma_max ** (1.0 / rho)
    l = np.linspace(0.0, 1.0, denoise_steps)
    sigmas = (max_inv_rho + l * (min_inv_rho - max_inv_rho)) ** rho
    return np.concatenate([sigmas, np.zeros(1)])


def build_step_tables(sigmas, params):
    """Per-step EDM coefficients (f64 host math) + time-embedding table."""
    n = len(sigmas) - 1
    gamma_ = min(S_CHURN / max(n, 1), 2 ** 0.5 - 1)       # == 0 (s_churn = 0)
    coef = np.zeros((n, 4), np.float64)
    c_noise = np.zeros((n,), np.float64)
    for i in range(n):
        sigma, next_sigma = float(sigmas[i]), float(sigmas[i + 1])
        gamma = gamma_ if S_TMIN <= sigma <= S_TMAX else 0.0
        sigma_hat = sigma * (gamma + 1.0)
        sig = math.sqrt(sigma * sigma + SIGMA_OFFSET_NOISE ** 2)
        c_in = 1.0 / math.sqrt(sig * sig + SIGMA_DATA ** 2)
        c_skip = SIGMA_DATA ** 2 / (sig * sig + SIGMA_DATA ** 2)
        c_out = sig * math.sqrt(c_skip)
        c_noise[i] = math.log(sig) / 4.0
        dt = next_sigma - sigma_hat
        coef[i] = (c_in, c_skip, c_out, dt / sigma_hat)
    # time embedding depends only on c_noise -> precompute all steps at once
    cn = jnp.asarray(c_noise, jnp.float32).reshape(n, 1)
    temb = (jnp.tanh(cn @ params['wt1'] + params['bt1']) @ params['wt2']
            + params['bt2'])                              # [n, H]
    return (jnp.asarray(coef.reshape(-1), jnp.float32),   # flat 1-D SMEM table
            temb.astype(jnp.float32))


def build_mix_matrix(wmix, B, Sc, Sp, bsc_pad):
    """Fold residual token mixing + 'keep last Sp tokens' into one [R, R]
    block matrix aligned with the stacked [cond_pad | x] row layout."""
    eye_b = jnp.eye(B, dtype=jnp.float32)
    wc = jnp.kron(eye_b, wmix[Sc:, :Sc])                               # [B*Sp, B*Sc]
    wx = jnp.kron(eye_b, wmix[Sc:, Sc:] + jnp.eye(Sp, dtype=jnp.float32))
    R = bsc_pad + B * Sp
    w_all = jnp.zeros((R, R), jnp.float32)
    w_all = w_all.at[bsc_pad:, :B * Sc].set(wc)    # pad-row columns stay zero
    w_all = w_all.at[bsc_pad:, bsc_pad:].set(wx)   # cond output rows stay zero
    return w_all.astype(jnp.bfloat16)


def init_inner_model_params(key, D, H, S):
    ks = jax.random.split(key, 7)
    scale = 0.2
    return dict(
        wt1=scale * jax.random.normal(ks[0], (1, H), jnp.float32),
        bt1=jnp.zeros((1, H), jnp.float32),
        wt2=scale * jax.random.normal(ks[1], (H, H), jnp.float32),
        bt2=jnp.zeros((1, H), jnp.float32),
        win=scale * jax.random.normal(ks[2], (D, H), jnp.float32),
        bin=jnp.zeros((1, H), jnp.float32),
        wmix=scale * jax.random.normal(ks[3], (S, S), jnp.float32),
        whid=scale * jax.random.normal(ks[4], (H, H), jnp.float32),
        bhid=jnp.zeros((1, H), jnp.float32),
        wout=scale * jax.random.normal(ks[5], (H, D), jnp.float32),
        bout=jnp.zeros((1, D), jnp.float32),
    )


def edm_sample(cond, x_init, params, sampler, bsc_pad):
    """EDMDiffusion.sample (== forward): s_churn=0, order=1, returns=None."""
    B, Sc, D = cond.shape
    Sp = x_init.shape[1]
    R = bsc_pad + B * Sp

    sigmas = build_sigma(NUM_DENOISE_STEPS, SIGMA_MIN, SIGMA_MAX_SAMPLER, RHO)
    coef, temb = build_step_tables(sigmas, params)
    w_all = build_mix_matrix(params['wmix'], B, Sc, Sp, bsc_pad)

    # Stacked state: rows [0, B*Sc) = cond / sigma_data, then zero padding up
    # to bsc_pad (sublane alignment), then B*Sp rows of initial noise.
    xs0 = jnp.zeros((R, D), jnp.float32)
    xs0 = xs0.at[:B * Sc].set(cond.reshape(B * Sc, D) * (1.0 / SIGMA_DATA))
    xs0 = xs0.at[bsc_pad:].set(x_init.reshape(B * Sp, D))
    mask = jnp.zeros((R, 1), jnp.float32).at[bsc_pad:].set(1.0)

    xs_out = sampler(coef, temb, xs0, mask,
                     params['win'].astype(jnp.bfloat16), params['bin'],
                     w_all,
                     params['whid'].astype(jnp.bfloat16), params['bhid'],
                     params['wout'].astype(jnp.bfloat16), params['bout'])
    x_final = xs_out[bsc_pad:].reshape(B, Sp, D)
    # TODO(synk): returns-conditioned classifier-free guidance path
    # (returns_condition=True) is not exercised; returns=None here.
    return jnp.concatenate([cond, x_final], axis=1)


if __name__ == "__main__":
    # small shapes consistent with the module:
    # observation_dim=11, action_dim=4 -> transition_dim D = 11 + 4 + 1 = 16
    B = 2
    horizon = 8
    cond_length = 2
    obs_dim, act_dim = 11, 4
    D = obs_dim + act_dim + 1             # 16
    H = 32                                # inner-model hidden width
    Sp = horizon - cond_length            # predict_seq_len = 6

    bsc_pad = ((B * cond_length + 7) // 8) * 8      # cond rows padded to 8
    R = bsc_pad + B * Sp                            # 20 stacked rows

    key = jax.random.PRNGKey(0)
    k_cond, k_x, k_params = jax.random.split(key, 3)

    cond = jax.random.normal(k_cond, (B, cond_length, D), jnp.float32)
    x_init = jax.random.normal(k_x, (B, Sp, D), jnp.float32)   # torch.randn in sample()
    params = init_inner_model_params(k_params, D, H, horizon)

    sampler = make_sampler(R, D, NUM_DENOISE_STEPS)
    total_traj = edm_sample(cond, x_init, params, sampler, bsc_pad)
    total_traj = jax.block_until_ready(total_traj)

    assert total_traj.shape == (B, horizon, D)
    assert bool(jnp.all(jnp.isfinite(total_traj)))
    print("KERNEL_OK")
</pallas_src>

<mosaic_0001>
module attributes {stable_mosaic.version = 11 : i64} {
  func.func @kernel(%arg0: memref<20xf32, #tpu.memory_space<smem>>, %arg1: memref<5x32xf32, #tpu.memory_space<vmem>>, %arg2: memref<20x16xf32, #tpu.memory_space<vmem>>, %arg3: memref<20x1xf32, #tpu.memory_space<vmem>>, %arg4: memref<16x32xbf16, #tpu.memory_space<vmem>>, %arg5: memref<1x32xf32, #tpu.memory_space<vmem>>, %arg6: memref<20x20xbf16, #tpu.memory_space<vmem>>, %arg7: memref<32x32xbf16, #tpu.memory_space<vmem>>, %arg8: memref<1x32xf32, #tpu.memory_space<vmem>>, %arg9: memref<32x16xbf16, #tpu.memory_space<vmem>>, %arg10: memref<1x16xf32, #tpu.memory_space<vmem>>, %arg11: memref<20x16xf32, #tpu.memory_space<vmem>>) attributes {dimension_semantics = [], scalar_prefetch = 0 : i64, scratch_operands = 0 : i64, tpu.core_type = #tpu.core_type<tc>} {
    %c0 = arith.constant 0 : index
    %c0_0 = arith.constant 0 : index
    %0 = vector.load %arg3[%c0, %c0_0] : memref<20x1xf32, #tpu.memory_space<vmem>>, vector<20x1xf32>
    %c0_1 = arith.constant 0 : index
    %c0_2 = arith.constant 0 : index
    %1 = vector.load %arg4[%c0_1, %c0_2] : memref<16x32xbf16, #tpu.memory_space<vmem>>, vector<16x32xbf16>
    %c0_3 = arith.constant 0 : index
    %c0_4 = arith.constant 0 : index
    %2 = vector.load %arg6[%c0_3, %c0_4] : memref<20x20xbf16, #tpu.memory_space<vmem>>, vector<20x20xbf16>
    %c0_5 = arith.constant 0 : index
    %c0_6 = arith.constant 0 : index
    %3 = vector.load %arg7[%c0_5, %c0_6] : memref<32x32xbf16, #tpu.memory_space<vmem>>, vector<32x32xbf16>
    %c0_7 = arith.constant 0 : index
    %c0_8 = arith.constant 0 : index
    %4 = vector.load %arg9[%c0_7, %c0_8] : memref<32x16xbf16, #tpu.memory_space<vmem>>, vector<32x16xbf16>
    %c0_9 = arith.constant 0 : index
    %c0_10 = arith.constant 0 : index
    %5 = vector.load %arg5[%c0_9, %c0_10] : memref<1x32xf32, #tpu.memory_space<vmem>>, vector<1x32xf32>
    %c0_11 = arith.constant 0 : index
    %c0_12 = arith.constant 0 : index
    %6 = vector.load %arg8[%c0_11, %c0_12] : memref<1x32xf32, #tpu.memory_space<vmem>>, vector<1x32xf32>
    %c0_13 = arith.constant 0 : index
    %c0_14 = arith.constant 0 : index
    %7 = vector.load %arg10[%c0_13, %c0_14] : memref<1x16xf32, #tpu.memory_space<vmem>>, vector<1x16xf32>
    %c0_15 = arith.constant 0 : index
    %c0_16 = arith.constant 0 : index
    %8 = vector.load %arg2[%c0_15, %c0_16] : memref<20x16xf32, #tpu.memory_space<vmem>>, vector<20x16xf32>
    %c0_i32 = arith.constant 0 : i32
    %c4_i32 = arith.constant 4 : i32
    %9 = arith.muli %c0_i32, %c4_i32 : i32
    %c0_i32_17 = arith.constant 0 : i32
    %10 = arith.addi %9, %c0_i32_17 : i32
    %11 = arith.index_cast %10 : i32 to index
    %12 = memref.load %arg0[%11] : memref<20xf32, #tpu.memory_space<smem>>
    %c4_i32_18 = arith.constant 4 : i32
    %13 = arith.muli %c0_i32, %c4_i32_18 : i32
    %c1_i32 = arith.constant 1 : i32
    %14 = arith.addi %13, %c1_i32 : i32
    %15 = arith.index_cast %14 : i32 to index
    %16 = memref.load %arg0[%15] : memref<20xf32, #tpu.memory_space<smem>>
    %c4_i32_19 = arith.constant 4 : i32
    %17 = arith.muli %c0_i32, %c4_i32_19 : i32
    %c2_i32 = arith.constant 2 : i32
    %18 = arith.addi %17, %c2_i32 : i32
    %19 = arith.index_cast %18 : i32 to index
    %20 = memref.load %arg0[%19] : memref<20xf32, #tpu.memory_space<smem>>
    %c4_i32_20 = arith.constant 4 : i32
    %21 = arith.muli %c0_i32, %c4_i32_20 : i32
    %c3_i32 = arith.constant 3 : i32
    %22 = arith.addi %21, %c3_i32 : i32
    %23 = arith.index_cast %22 : i32 to index
    %24 = memref.load %arg0[%23] : memref<20xf32, #tpu.memory_space<smem>>
    %25 = arith.index_cast %c0_i32 : i32 to index
    %c0_21 = arith.constant 0 : index
    %26 = vector.load %arg1[%25, %c0_21] : memref<5x32xf32, #tpu.memory_space<vmem>>, vector<1x32xf32>
    %cst = arith.constant 1.000000e+00 : f32
    %27 = arith.subf %12, %cst : f32
    %28 = vector.broadcast %27 : f32 to vector<20x1xf32>
    %29 = arith.mulf %0, %28 : vector<20x1xf32>
    %cst_22 = arith.constant 1.000000e+00 : f32
    %30 = vector.broadcast %cst_22 : f32 to vector<20x1xf32>
    %31 = arith.addf %30, %29 : vector<20x1xf32>
    %32 = vector.broadcast %31 : vector<20x1xf32> to vector<20x16xf32>
    %33 = arith.mulf %8, %32 : vector<20x16xf32>
    %34 = arith.truncf %33 : vector<20x16xf32> to vector<20x16xbf16>
    %cst_23 = arith.constant dense<0.000000e+00> : vector<20x32xf32>
    %35 = tpu.matmul %34, %1, %cst_23 {dimension_numbers = #tpu.dot_dimension_numbers<[1], [0], [0], [1], [0, 0, 1, 1], [], []>} : vector<20x16xbf16>, vector<16x32xbf16>, vector<20x32xf32> -> vector<20x32xf32>
    %36 = vector.broadcast %5 : vector<1x32xf32> to vector<20x32xf32>
    %37 = arith.addf %35, %36 : vector<20x32xf32>
    %38 = vector.broadcast %26 : vector<1x32xf32> to vector<20x32xf32>
    %39 = arith.addf %37, %38 : vector<20x32xf32>
    %40 = arith.mulf %39, %39 : vector<20x32xf32>
    %41 = arith.mulf %39, %40 : vector<20x32xf32>
    %cst_24 = arith.constant 4.471500e-02 : f32
    %42 = vector.broadcast %cst_24 : f32 to vector<20x32xf32>
    %43 = arith.mulf %42, %41 : vector<20x32xf32>
    %44 = arith.addf %39, %43 : vector<20x32xf32>
    %cst_25 = arith.constant 0.797884583 : f32
    %45 = vector.broadcast %cst_25 : f32 to vector<20x32xf32>
    %46 = arith.mulf %45, %44 : vector<20x32xf32>
    %47 = math.tanh %46 : vector<20x32xf32>
    %cst_26 = arith.constant 1.000000e+00 : f32
    %48 = vector.broadcast %cst_26 : f32 to vector<20x32xf32>
    %49 = arith.addf %48, %47 : vector<20x32xf32>
    %cst_27 = arith.constant 5.000000e-01 : f32
    %50 = vector.broadcast %cst_27 : f32 to vector<20x32xf32>
    %51 = arith.mulf %50, %49 : vector<20x32xf32>
    %52 = arith.mulf %39, %51 : vector<20x32xf32>
    %53 = arith.truncf %52 : vector<20x32xf32> to vector<20x32xbf16>
    %cst_28 = arith.constant dense<0.000000e+00> : vector<20x32xf32>
    %54 = tpu.matmul %2, %53, %cst_28 {dimension_numbers = #tpu.dot_dimension_numbers<[1], [0], [0], [1], [0, 0, 1, 1], [], []>} : vector<20x20xbf16>, vector<20x32xbf16>, vector<20x32xf32> -> vector<20x32xf32>
    %55 = arith.truncf %54 : vector<20x32xf32> to vector<20x32xbf16>
    %cst_29 = arith.constant dense<0.000000e+00> : vector<20x32xf32>
    %56 = tpu.matmul %55, %3, %cst_29 {dimension_numbers = #tpu.dot_dimension_numbers<[1], [0], [0], [1], [0, 0, 1, 1], [], []>} : vector<20x32xbf16>, vector<32x32xbf16>, vector<20x32xf32> -> vector<20x32xf32>
    %57 = vector.broadcast %6 : vector<1x32xf32> to vector<20x32xf32>
    %58 = arith.addf %56, %57 : vector<20x32xf32>
    %59 = arith.mulf %58, %58 : vector<20x32xf32>
    %60 = arith.mulf %58, %59 : vector<20x32xf32>
    %cst_30 = arith.constant 4.471500e-02 : f32
    %61 = vector.broadcast %cst_30 : f32 to vector<20x32xf32>
    %62 = arith.mulf %61, %60 : vector<20x32xf32>
    %63 = arith.addf %58, %62 : vector<20x32xf32>
    %cst_31 = arith.constant 0.797884583 : f32
    %64 = vector.broadcast %cst_31 : f32 to vector<20x32xf32>
    %65 = arith.mulf %64, %63 : vector<20x32xf32>
    %66 = math.tanh %65 : vector<20x32xf32>
    %cst_32 = arith.constant 1.000000e+00 : f32
    %67 = vector.broadcast %cst_32 : f32 to vector<20x32xf32>
    %68 = arith.addf %67, %66 : vector<20x32xf32>
    %cst_33 = arith.constant 5.000000e-01 : f32
    %69 = vector.broadcast %cst_33 : f32 to vector<20x32xf32>
    %70 = arith.mulf %69, %68 : vector<20x32xf32>
    %71 = arith.mulf %58, %70 : vector<20x32xf32>
    %72 = arith.truncf %71 : vector<20x32xf32> to vector<20x32xbf16>
    %cst_34 = arith.constant dense<0.000000e+00> : vector<20x16xf32>
    %73 = tpu.matmul %72, %4, %cst_34 {dimension_numbers = #tpu.dot_dimension_numbers<[1], [0], [0], [1], [0, 0, 1, 1], [], []>} : vector<20x32xbf16>, vector<32x16xbf16>, vector<20x16xf32> -> vector<20x16xf32>
    %74 = vector.broadcast %7 : vector<1x16xf32> to vector<20x16xf32>
    %75 = arith.addf %73, %74 : vector<20x16xf32>
    %76 = vector.broadcast %20 : f32 to vector<20x16xf32>
    %77 = arith.mulf %75, %76 : vector<20x16xf32>
    %78 = vector.broadcast %16 : f32 to vector<20x16xf32>
    %79 = arith.mulf %8, %78 : vector<20x16xf32>
    %80 = arith.addf %77, %79 : vector<20x16xf32>
    %81 = arith.subf %8, %80 : vector<20x16xf32>
    %82 = vector.broadcast %24 : f32 to vector<20x1xf32>
    %83 = arith.mulf %82, %0 : vector<20x1xf32>
    %84 = vector.broadcast %83 : vector<20x1xf32> to vector<20x16xf32>
    %85 = arith.mulf %81, %84 : vector<20x16xf32>
    %86 = arith.addf %8, %85 : vector<20x16xf32>
    %c1_i32_35 = arith.constant 1 : i32
    %c4_i32_36 = arith.constant 4 : i32
    %87 = arith.muli %c1_i32_35, %c4_i32_36 : i32
    %c0_i32_37 = arith.constant 0 : i32
    %88 = arith.addi %87, %c0_i32_37 : i32
    %89 = arith.index_cast %88 : i32 to index
    %90 = memref.load %arg0[%89] : memref<20xf32, #tpu.memory_space<smem>>
    %c4_i32_38 = arith.constant 4 : i32
    %91 = arith.muli %c1_i32_35, %c4_i32_38 : i32
    %c1_i32_39 = arith.constant 1 : i32
    %92 = arith.addi %91, %c1_i32_39 : i32
    %93 = arith.index_cast %92 : i32 to index
    %94 = memref.load %arg0[%93] : memref<20xf32, #tpu.memory_space<smem>>
    %c4_i32_40 = arith.constant 4 : i32
    %95 = arith.muli %c1_i32_35, %c4_i32_40 : i32
    %c2_i32_41 = arith.constant 2 : i32
    %96 = arith.addi %95, %c2_i32_41 : i32
    %97 = arith.index_cast %96 : i32 to index
    %98 = memref.load %arg0[%97] : memref<20xf32, #tpu.memory_space<smem>>
    %c4_i32_42 = arith.constant 4 : i32
    %99 = arith.muli %c1_i32_35, %c4_i32_42 : i32
    %c3_i32_43 = arith.constant 3 : i32
    %100 = arith.addi %99, %c3_i32_43 : i32
    %101 = arith.index_cast %100 : i32 to index
    %102 = memref.load %arg0[%101] : memref<20xf32, #tpu.memory_space<smem>>
    %103 = arith.index_cast %c1_i32_35 : i32 to index
    %c0_44 = arith.constant 0 : index
    %104 = vector.load %arg1[%103, %c0_44] : memref<5x32xf32, #tpu.memory_space<vmem>>, vector<1x32xf32>
    %cst_45 = arith.constant 1.000000e+00 : f32
    %105 = arith.subf %90, %cst_45 : f32
    %106 = vector.broadcast %105 : f32 to vector<20x1xf32>
    %107 = arith.mulf %0, %106 : vector<20x1xf32>
    %cst_46 = arith.constant 1.000000e+00 : f32
    %108 = vector.broadcast %cst_46 : f32 to vector<20x1xf32>
    %109 = arith.addf %108, %107 : vector<20x1xf32>
    %110 = vector.broadcast %109 : vector<20x1xf32> to vector<20x16xf32>
    %111 = arith.mulf %86, %110 : vector<20x16xf32>
    %112 = arith.truncf %111 : vector<20x16xf32> to vector<20x16xbf16>
    %cst_47 = arith.constant dense<0.000000e+00> : vector<20x32xf32>
    %113 = tpu.matmul %112, %1, %cst_47 {dimension_numbers = #tpu.dot_dimension_numbers<[1], [0], [0], [1], [0, 0, 1, 1], [], []>} : vector<20x16xbf16>, vector<16x32xbf16>, vector<20x32xf32> -> vector<20x32xf32>
    %114 = vector.broadcast %5 : vector<1x32xf32> to vector<20x32xf32>
    %115 = arith.addf %113, %114 : vector<20x32xf32>
    %116 = vector.broadcast %104 : vector<1x32xf32> to vector<20x32xf32>
    %117 = arith.addf %115, %116 : vector<20x32xf32>
    %118 = arith.mulf %117, %117 : vector<20x32xf32>
    %119 = arith.mulf %117, %118 : vector<20x32xf32>
    %cst_48 = arith.constant 4.471500e-02 : f32
    %120 = vector.broadcast %cst_48 : f32 to vector<20x32xf32>
    %121 = arith.mulf %120, %119 : vector<20x32xf32>
    %122 = arith.addf %117, %121 : vector<20x32xf32>
    %cst_49 = arith.constant 0.797884583 : f32
    %123 = vector.broadcast %cst_49 : f32 to vector<20x32xf32>
    %124 = arith.mulf %123, %122 : vector<20x32xf32>
    %125 = math.tanh %124 : vector<20x32xf32>
    %cst_50 = arith.constant 1.000000e+00 : f32
    %126 = vector.broadcast %cst_50 : f32 to vector<20x32xf32>
    %127 = arith.addf %126, %125 : vector<20x32xf32>
    %cst_51 = arith.constant 5.000000e-01 : f32
    %128 = vector.broadcast %cst_51 : f32 to vector<20x32xf32>
    %129 = arith.mulf %128, %127 : vector<20x32xf32>
    %130 = arith.mulf %117, %129 : vector<20x32xf32>
    %131 = arith.truncf %130 : vector<20x32xf32> to vector<20x32xbf16>
    %cst_52 = arith.constant dense<0.000000e+00> : vector<20x32xf32>
    %132 = tpu.matmul %2, %131, %cst_52 {dimension_numbers = #tpu.dot_dimension_numbers<[1], [0], [0], [1], [0, 0, 1, 1], [], []>} : vector<20x20xbf16>, vector<20x32xbf16>, vector<20x32xf32> -> vector<20x32xf32>
    %133 = arith.truncf %132 : vector<20x32xf32> to vector<20x32xbf16>
    %cst_53 = arith.constant dense<0.000000e+00> : vector<20x32xf32>
    %134 = tpu.matmul %133, %3, %cst_53 {dimension_numbers = #tpu.dot_dimension_numbers<[1], [0], [0], [1], [0, 0, 1, 1], [], []>} : vector<20x32xbf16>, vector<32x32xbf16>, vector<20x32xf32> -> vector<20x32xf32>
    %135 = vector.broadcast %6 : vector<1x32xf32> to vector<20x32xf32>
    %136 = arith.addf %134, %135 : vector<20x32xf32>
    %137 = arith.mulf %136, %136 : vector<20x32xf32>
    %138 = arith.mulf %136, %137 : vector<20x32xf32>
    %cst_54 = arith.constant 4.471500e-02 : f32
    %139 = vector.broadcast %cst_54 : f32 to vector<20x32xf32>
    %140 = arith.mulf %139, %138 : vector<20x32xf32>
    %141 = arith.addf %136, %140 : vector<20x32xf32>
    %cst_55 = arith.constant 0.797884583 : f32
    %142 = vector.broadcast %cst_55 : f32 to vector<20x32xf32>
    %143 = arith.mulf %142, %141 : vector<20x32xf32>
    %144 = math.tanh %143 : vector<20x32xf32>
    %cst_56 = arith.constant 1.000000e+00 : f32
    %145 = vector.broadcast %cst_56 : f32 to vector<20x32xf32>
    %146 = arith.addf %145, %144 : vector<20x32xf32>
    %cst_57 = arith.constant 5.000000e-01 : f32
    %147 = vector.broadcast %cst_57 : f32 to vector<20x32xf32>
    %148 = arith.mulf %147, %146 : vector<20x32xf32>
    %149 = arith.mulf %136, %148 : vector<20x32xf32>
    %150 = arith.truncf %149 : vector<20x32xf32> to vector<20x32xbf16>
    %cst_58 = arith.constant dense<0.000000e+00> : vector<20x16xf32>
    %151 = tpu.matmul %150, %4, %cst_58 {dimension_numbers = #tpu.dot_dimension_numbers<[1], [0], [0], [1], [0, 0, 1, 1], [], []>} : vector<20x32xbf16>, vector<32x16xbf16>, vector<20x16xf32> -> vector<20x16xf32>
    %152 = vector.broadcast %7 : vector<1x16xf32> to vector<20x16xf32>
    %153 = arith.addf %151, %152 : vector<20x16xf32>
    %154 = vector.broadcast %98 : f32 to vector<20x16xf32>
    %155 = arith.mulf %153, %154 : vector<20x16xf32>
    %156 = vector.broadcast %94 : f32 to vector<20x16xf32>
    %157 = arith.mulf %86, %156 : vector<20x16xf32>
    %158 = arith.addf %155, %157 : vector<20x16xf32>
    %159 = arith.subf %86, %158 : vector<20x16xf32>
    %160 = vector.broadcast %102 : f32 to vector<20x1xf32>
    %161 = arith.mulf %160, %0 : vector<20x1xf32>
    %162 = vector.broadcast %161 : vector<20x1xf32> to vector<20x16xf32>
    %163 = arith.mulf %159, %162 : vector<20x16xf32>
    %164 = arith.addf %86, %163 : vector<20x16xf32>
    %c2_i32_59 = arith.constant 2 : i32
    %c4_i32_60 = arith.constant 4 : i32
    %165 = arith.muli %c2_i32_59, %c4_i32_60 : i32
    %c0_i32_61 = arith.constant 0 : i32
    %166 = arith.addi %165, %c0_i32_61 : i32
    %167 = arith.index_cast %166 : i32 to index
    %168 = memref.load %arg0[%167] : memref<20xf32, #tpu.memory_space<smem>>
    %c4_i32_62 = arith.constant 4 : i32
    %169 = arith.muli %c2_i32_59, %c4_i32_62 : i32
    %c1_i32_63 = arith.constant 1 : i32
    %170 = arith.addi %169, %c1_i32_63 : i32
    %171 = arith.index_cast %170 : i32 to index
    %172 = memref.load %arg0[%171] : memref<20xf32, #tpu.memory_space<smem>>
    %c4_i32_64 = arith.constant 4 : i32
    %173 = arith.muli %c2_i32_59, %c4_i32_64 : i32
    %c2_i32_65 = arith.constant 2 : i32
    %174 = arith.addi %173, %c2_i32_65 : i32
    %175 = arith.index_cast %174 : i32 to index
    %176 = memref.load %arg0[%175] : memref<20xf32, #tpu.memory_space<smem>>
    %c4_i32_66 = arith.constant 4 : i32
    %177 = arith.muli %c2_i32_59, %c4_i32_66 : i32
    %c3_i32_67 = arith.constant 3 : i32
    %178 = arith.addi %177, %c3_i32_67 : i32
    %179 = arith.index_cast %178 : i32 to index
    %180 = memref.load %arg0[%179] : memref<20xf32, #tpu.memory_space<smem>>
    %181 = arith.index_cast %c2_i32_59 : i32 to index
    %c0_68 = arith.constant 0 : index
    %182 = vector.load %arg1[%181, %c0_68] : memref<5x32xf32, #tpu.memory_space<vmem>>, vector<1x32xf32>
    %cst_69 = arith.constant 1.000000e+00 : f32
    %183 = arith.subf %168, %cst_69 : f32
    %184 = vector.broadcast %183 : f32 to vector<20x1xf32>
    %185 = arith.mulf %0, %184 : vector<20x1xf32>
    %cst_70 = arith.constant 1.000000e+00 : f32
    %186 = vector.broadcast %cst_70 : f32 to vector<20x1xf32>
    %187 = arith.addf %186, %185 : vector<20x1xf32>
    %188 = vector.broadcast %187 : vector<20x1xf32> to vector<20x16xf32>
    %189 = arith.mulf %164, %188 : vector<20x16xf32>
    %190 = arith.truncf %189 : vector<20x16xf32> to vector<20x16xbf16>
    %cst_71 = arith.constant dense<0.000000e+00> : vector<20x32xf32>
    %191 = tpu.matmul %190, %1, %cst_71 {dimension_numbers = #tpu.dot_dimension_numbers<[1], [0], [0], [1], [0, 0, 1, 1], [], []>} : vector<20x16xbf16>, vector<16x32xbf16>, vector<20x32xf32> -> vector<20x32xf32>
    %192 = vector.broadcast %5 : vector<1x32xf32> to vector<20x32xf32>
    %193 = arith.addf %191, %192 : vector<20x32xf32>
    %194 = vector.broadcast %182 : vector<1x32xf32> to vector<20x32xf32>
    %195 = arith.addf %193, %194 : vector<20x32xf32>
    %196 = arith.mulf %195, %195 : vector<20x32xf32>
    %197 = arith.mulf %195, %196 : vector<20x32xf32>
    %cst_72 = arith.constant 4.471500e-02 : f32
    %198 = vector.broadcast %cst_72 : f32 to vector<20x32xf32>
    %199 = arith.mulf %198, %197 : vector<20x32xf32>
    %200 = arith.addf %195, %199 : vector<20x32xf32>
    %cst_73 = arith.constant 0.797884583 : f32
    %201 = vector.broadcast %cst_73 : f32 to vector<20x32xf32>
    %202 = arith.mulf %201, %200 : vector<20x32xf32>
    %203 = math.tanh %202 : vector<20x32xf32>
    %cst_74 = arith.constant 1.000000e+00 : f32
    %204 = vector.broadcast %cst_74 : f32 to vector<20x32xf32>
    %205 = arith.addf %204, %203 : vector<20x32xf32>
    %cst_75 = arith.constant 5.000000e-01 : f32
    %206 = vector.broadcast %cst_75 : f32 to vector<20x32xf32>
    %207 = arith.mulf %206, %205 : vector<20x32xf32>
    %208 = arith.mulf %195, %207 : vector<20x32xf32>
    %209 = arith.truncf %208 : vector<20x32xf32> to vector<20x32xbf16>
    %cst_76 = arith.constant dense<0.000000e+00> : vector<20x32xf32>
    %210 = tpu.matmul %2, %209, %cst_76 {dimension_numbers = #tpu.dot_dimension_numbers<[1], [0], [0], [1], [0, 0, 1, 1], [], []>} : vector<20x20xbf16>, vector<20x32xbf16>, vector<20x32xf32> -> vector<20x32xf32>
    %211 = arith.truncf %210 : vector<20x32xf32> to vector<20x32xbf16>
    %cst_77 = arith.constant dense<0.000000e+00> : vector<20x32xf32>
    %212 = tpu.matmul %211, %3, %cst_77 {dimension_numbers = #tpu.dot_dimension_numbers<[1], [0], [0], [1], [0, 0, 1, 1], [], []>} : vector<20x32xbf16>, vector<32x32xbf16>, vector<20x32xf32> -> vector<20x32xf32>
    %213 = vector.broadcast %6 : vector<1x32xf32> to vector<20x32xf32>
    %214 = arith.addf %212, %213 : vector<20x32xf32>
    %215 = arith.mulf %214, %214 : vector<20x32xf32>
    %216 = arith.mulf %214, %215 : vector<20x32xf32>
    %cst_78 = arith.constant 4.471500e-02 : f32
    %217 = vector.broadcast %cst_78 : f32 to vector<20x32xf32>
    %218 = arith.mulf %217, %216 : vector<20x32xf32>
    %219 = arith.addf %214, %218 : vector<20x32xf32>
    %cst_79 = arith.constant 0.797884583 : f32
    %220 = vector.broadcast %cst_79 : f32 to vector<20x32xf32>
    %221 = arith.mulf %220, %219 : vector<20x32xf32>
    %222 = math.tanh %221 : vector<20x32xf32>
    %cst_80 = arith.constant 1.000000e+00 : f32
    %223 = vector.broadcast %cst_80 : f32 to vector<20x32xf32>
    %224 = arith.addf %223, %222 : vector<20x32xf32>
    %cst_81 = arith.constant 5.000000e-01 : f32
    %225 = vector.broadcast %cst_81 : f32 to vector<20x32xf32>
    %226 = arith.mulf %225, %224 : vector<20x32xf32>
    %227 = arith.mulf %214, %226 : vector<20x32xf32>
    %228 = arith.truncf %227 : vector<20x32xf32> to vector<20x32xbf16>
    %cst_82 = arith.constant dense<0.000000e+00> : vector<20x16xf32>
    %229 = tpu.matmul %228, %4, %cst_82 {dimension_numbers = #tpu.dot_dimension_numbers<[1], [0], [0], [1], [0, 0, 1, 1], [], []>} : vector<20x32xbf16>, vector<32x16xbf16>, vector<20x16xf32> -> vector<20x16xf32>
    %230 = vector.broadcast %7 : vector<1x16xf32> to vector<20x16xf32>
    %231 = arith.addf %229, %230 : vector<20x16xf32>
    %232 = vector.broadcast %176 : f32 to vector<20x16xf32>
    %233 = arith.mulf %231, %232 : vector<20x16xf32>
    %234 = vector.broadcast %172 : f32 to vector<20x16xf32>
    %235 = arith.mulf %164, %234 : vector<20x16xf32>
    %236 = arith.addf %233, %235 : vector<20x16xf32>
    %237 = arith.subf %164, %236 : vector<20x16xf32>
    %238 = vector.broadcast %180 : f32 to vector<20x1xf32>
    %239 = arith.mulf %238, %0 : vector<20x1xf32>
    %240 = vector.broadcast %239 : vector<20x1xf32> to vector<20x16xf32>
    %241 = arith.mulf %237, %240 : vector<20x16xf32>
    %242 = arith.addf %164, %241 : vector<20x16xf32>
    %c3_i32_83 = arith.constant 3 : i32
    %c4_i32_84 = arith.constant 4 : i32
    %243 = arith.muli %c3_i32_83, %c4_i32_84 : i32
    %c0_i32_85 = arith.constant 0 : i32
    %244 = arith.addi %243, %c0_i32_85 : i32
    %245 = arith.index_cast %244 : i32 to index
    %246 = memref.load %arg0[%245] : memref<20xf32, #tpu.memory_space<smem>>
    %c4_i32_86 = arith.constant 4 : i32
    %247 = arith.muli %c3_i32_83, %c4_i32_86 : i32
    %c1_i32_87 = arith.constant 1 : i32
    %248 = arith.addi %247, %c1_i32_87 : i32
    %249 = arith.index_cast %248 : i32 to index
    %250 = memref.load %arg0[%249] : memref<20xf32, #tpu.memory_space<smem>>
    %c4_i32_88 = arith.constant 4 : i32
    %251 = arith.muli %c3_i32_83, %c4_i32_88 : i32
    %c2_i32_89 = arith.constant 2 : i32
    %252 = arith.addi %251, %c2_i32_89 : i32
    %253 = arith.index_cast %252 : i32 to index
    %254 = memref.load %arg0[%253] : memref<20xf32, #tpu.memory_space<smem>>
    %c4_i32_90 = arith.constant 4 : i32
    %255 = arith.muli %c3_i32_83, %c4_i32_90 : i32
    %c3_i32_91 = arith.constant 3 : i32
    %256 = arith.addi %255, %c3_i32_91 : i32
    %257 = arith.index_cast %256 : i32 to index
    %258 = memref.load %arg0[%257] : memref<20xf32, #tpu.memory_space<smem>>
    %259 = arith.index_cast %c3_i32_83 : i32 to index
    %c0_92 = arith.constant 0 : index
    %260 = vector.load %arg1[%259, %c0_92] : memref<5x32xf32, #tpu.memory_space<vmem>>, vector<1x32xf32>
    %cst_93 = arith.constant 1.000000e+00 : f32
    %261 = arith.subf %246, %cst_93 : f32
    %262 = vector.broadcast %261 : f32 to vector<20x1xf32>
    %263 = arith.mulf %0, %262 : vector<20x1xf32>
    %cst_94 = arith.constant 1.000000e+00 : f32
    %264 = vector.broadcast %cst_94 : f32 to vector<20x1xf32>
    %265 = arith.addf %264, %263 : vector<20x1xf32>
    %266 = vector.broadcast %265 : vector<20x1xf32> to vector<20x16xf32>
    %267 = arith.mulf %242, %266 : vector<20x16xf32>
    %268 = arith.truncf %267 : vector<20x16xf32> to vector<20x16xbf16>
    %cst_95 = arith.constant dense<0.000000e+00> : vector<20x32xf32>
    %269 = tpu.matmul %268, %1, %cst_95 {dimension_numbers = #tpu.dot_dimension_numbers<[1], [0], [0], [1], [0, 0, 1, 1], [], []>} : vector<20x16xbf16>, vector<16x32xbf16>, vector<20x32xf32> -> vector<20x32xf32>
    %270 = vector.broadcast %5 : vector<1x32xf32> to vector<20x32xf32>
    %271 = arith.addf %269, %270 : vector<20x32xf32>
    %272 = vector.broadcast %260 : vector<1x32xf32> to vector<20x32xf32>
    %273 = arith.addf %271, %272 : vector<20x32xf32>
    %274 = arith.mulf %273, %273 : vector<20x32xf32>
    %275 = arith.mulf %273, %274 : vector<20x32xf32>
    %cst_96 = arith.constant 4.471500e-02 : f32
    %276 = vector.broadcast %cst_96 : f32 to vector<20x32xf32>
    %277 = arith.mulf %276, %275 : vector<20x32xf32>
    %278 = arith.addf %273, %277 : vector<20x32xf32>
    %cst_97 = arith.constant 0.797884583 : f32
    %279 = vector.broadcast %cst_97 : f32 to vector<20x32xf32>
    %280 = arith.mulf %279, %278 : vector<20x32xf32>
    %281 = math.tanh %280 : vector<20x32xf32>
    %cst_98 = arith.constant 1.000000e+00 : f32
    %282 = vector.broadcast %cst_98 : f32 to vector<20x32xf32>
    %283 = arith.addf %282, %281 : vector<20x32xf32>
    %cst_99 = arith.constant 5.000000e-01 : f32
    %284 = vector.broadcast %cst_99 : f32 to vector<20x32xf32>
    %285 = arith.mulf %284, %283 : vector<20x32xf32>
    %286 = arith.mulf %273, %285 : vector<20x32xf32>
    %287 = arith.truncf %286 : vector<20x32xf32> to vector<20x32xbf16>
    %cst_100 = arith.constant dense<0.000000e+00> : vector<20x32xf32>
    %288 = tpu.matmul %2, %287, %cst_100 {dimension_numbers = #tpu.dot_dimension_numbers<[1], [0], [0], [1], [0, 0, 1, 1], [], []>} : vector<20x20xbf16>, vector<20x32xbf16>, vector<20x32xf32> -> vector<20x32xf32>
    %289 = arith.truncf %288 : vector<20x32xf32> to vector<20x32xbf16>
    %cst_101 = arith.constant dense<0.000000e+00> : vector<20x32xf32>
    %290 = tpu.matmul %289, %3, %cst_101 {dimension_numbers = #tpu.dot_dimension_numbers<[1], [0], [0], [1], [0, 0, 1, 1], [], []>} : vector<20x32xbf16>, vector<32x32xbf16>, vector<20x32xf32> -> vector<20x32xf32>
    %291 = vector.broadcast %6 : vector<1x32xf32> to vector<20x32xf32>
    %292 = arith.addf %290, %291 : vector<20x32xf32>
    %293 = arith.mulf %292, %292 : vector<20x32xf32>
    %294 = arith.mulf %292, %293 : vector<20x32xf32>
    %cst_102 = arith.constant 4.471500e-02 : f32
    %295 = vector.broadcast %cst_102 : f32 to vector<20x32xf32>
    %296 = arith.mulf %295, %294 : vector<20x32xf32>
    %297 = arith.addf %292, %296 : vector<20x32xf32>
    %cst_103 = arith.constant 0.797884583 : f32
    %298 = vector.broadcast %cst_103 : f32 to vector<20x32xf32>
    %299 = arith.mulf %298, %297 : vector<20x32xf32>
    %300 = math.tanh %299 : vector<20x32xf32>
    %cst_104 = arith.constant 1.000000e+00 : f32
    %301 = vector.broadcast %cst_104 : f32 to vector<20x32xf32>
    %302 = arith.addf %301, %300 : vector<20x32xf32>
    %cst_105 = arith.constant 5.000000e-01 : f32
    %303 = vector.broadcast %cst_105 : f32 to vector<20x32xf32>
    %304 = arith.mulf %303, %302 : vector<20x32xf32>
    %305 = arith.mulf %292, %304 : vector<20x32xf32>
    %306 = arith.truncf %305 : vector<20x32xf32> to vector<20x32xbf16>
    %cst_106 = arith.constant dense<0.000000e+00> : vector<20x16xf32>
    %307 = tpu.matmul %306, %4, %cst_106 {dimension_numbers = #tpu.dot_dimension_numbers<[1], [0], [0], [1], [0, 0, 1, 1], [], []>} : vector<20x32xbf16>, vector<32x16xbf16>, vector<20x16xf32> -> vector<20x16xf32>
    %308 = vector.broadcast %7 : vector<1x16xf32> to vector<20x16xf32>
    %309 = arith.addf %307, %308 : vector<20x16xf32>
    %310 = vector.broadcast %254 : f32 to vector<20x16xf32>
    %311 = arith.mulf %309, %310 : vector<20x16xf32>
    %312 = vector.broadcast %250 : f32 to vector<20x16xf32>
    %313 = arith.mulf %242, %312 : vector<20x16xf32>
    %314 = arith.addf %311, %313 : vector<20x16xf32>
    %315 = arith.subf %242, %314 : vector<20x16xf32>
    %316 = vector.broadcast %258 : f32 to vector<20x1xf32>
    %317 = arith.mulf %316, %0 : vector<20x1xf32>
    %318 = vector.broadcast %317 : vector<20x1xf32> to vector<20x16xf32>
    %319 = arith.mulf %315, %318 : vector<20x16xf32>
    %320 = arith.addf %242, %319 : vector<20x16xf32>
    %c4_i32_107 = arith.constant 4 : i32
    %c4_i32_108 = arith.constant 4 : i32
    %321 = arith.muli %c4_i32_107, %c4_i32_108 : i32
    %c0_i32_109 = arith.constant 0 : i32
    %322 = arith.addi %321, %c0_i32_109 : i32
    %323 = arith.index_cast %322 : i32 to index
    %324 = memref.load %arg0[%323] : memref<20xf32, #tpu.memory_space<smem>>
    %c4_i32_110 = arith.constant 4 : i32
    %325 = arith.muli %c4_i32_107, %c4_i32_110 : i32
    %c1_i32_111 = arith.constant 1 : i32
    %326 = arith.addi %325, %c1_i32_111 : i32
    %327 = arith.index_cast %326 : i32 to index
    %328 = memref.load %arg0[%327] : memref<20xf32, #tpu.memory_space<smem>>
    %c4_i32_112 = arith.constant 4 : i32
    %329 = arith.muli %c4_i32_107, %c4_i32_112 : i32
    %c2_i32_113 = arith.constant 2 : i32
    %330 = arith.addi %329, %c2_i32_113 : i32
    %331 = arith.index_cast %330 : i32 to index
    %332 = memref.load %arg0[%331] : memref<20xf32, #tpu.memory_space<smem>>
    %c4_i32_114 = arith.constant 4 : i32
    %333 = arith.muli %c4_i32_107, %c4_i32_114 : i32
    %c3_i32_115 = arith.constant 3 : i32
    %334 = arith.addi %333, %c3_i32_115 : i32
    %335 = arith.index_cast %334 : i32 to index
    %336 = memref.load %arg0[%335] : memref<20xf32, #tpu.memory_space<smem>>
    %337 = arith.index_cast %c4_i32_107 : i32 to index
    %c0_116 = arith.constant 0 : index
    %338 = vector.load %arg1[%337, %c0_116] : memref<5x32xf32, #tpu.memory_space<vmem>>, vector<1x32xf32>
    %cst_117 = arith.constant 1.000000e+00 : f32
    %339 = arith.subf %324, %cst_117 : f32
    %340 = vector.broadcast %339 : f32 to vector<20x1xf32>
    %341 = arith.mulf %0, %340 : vector<20x1xf32>
    %cst_118 = arith.constant 1.000000e+00 : f32
    %342 = vector.broadcast %cst_118 : f32 to vector<20x1xf32>
    %343 = arith.addf %342, %341 : vector<20x1xf32>
    %344 = vector.broadcast %343 : vector<20x1xf32> to vector<20x16xf32>
    %345 = arith.mulf %320, %344 : vector<20x16xf32>
    %346 = arith.truncf %345 : vector<20x16xf32> to vector<20x16xbf16>
    %cst_119 = arith.constant dense<0.000000e+00> : vector<20x32xf32>
    %347 = tpu.matmul %346, %1, %cst_119 {dimension_numbers = #tpu.dot_dimension_numbers<[1], [0], [0], [1], [0, 0, 1, 1], [], []>} : vector<20x16xbf16>, vector<16x32xbf16>, vector<20x32xf32> -> vector<20x32xf32>
    %348 = vector.broadcast %5 : vector<1x32xf32> to vector<20x32xf32>
    %349 = arith.addf %347, %348 : vector<20x32xf32>
    %350 = vector.broadcast %338 : vector<1x32xf32> to vector<20x32xf32>
    %351 = arith.addf %349, %350 : vector<20x32xf32>
    %352 = arith.mulf %351, %351 : vector<20x32xf32>
    %353 = arith.mulf %351, %352 : vector<20x32xf32>
    %cst_120 = arith.constant 4.471500e-02 : f32
    %354 = vector.broadcast %cst_120 : f32 to vector<20x32xf32>
    %355 = arith.mulf %354, %353 : vector<20x32xf32>
    %356 = arith.addf %351, %355 : vector<20x32xf32>
    %cst_121 = arith.constant 0.797884583 : f32
    %357 = vector.broadcast %cst_121 : f32 to vector<20x32xf32>
    %358 = arith.mulf %357, %356 : vector<20x32xf32>
    %359 = math.tanh %358 : vector<20x32xf32>
    %cst_122 = arith.constant 1.000000e+00 : f32
    %360 = vector.broadcast %cst_122 : f32 to vector<20x32xf32>
    %361 = arith.addf %360, %359 : vector<20x32xf32>
    %cst_123 = arith.constant 5.000000e-01 : f32
    %362 = vector.broadcast %cst_123 : f32 to vector<20x32xf32>
    %363 = arith.mulf %362, %361 : vector<20x32xf32>
    %364 = arith.mulf %351, %363 : vector<20x32xf32>
    %365 = arith.truncf %364 : vector<20x32xf32> to vector<20x32xbf16>
    %cst_124 = arith.constant dense<0.000000e+00> : vector<20x32xf32>
    %366 = tpu.matmul %2, %365, %cst_124 {dimension_numbers = #tpu.dot_dimension_numbers<[1], [0], [0], [1], [0, 0, 1, 1], [], []>} : vector<20x20xbf16>, vector<20x32xbf16>, vector<20x32xf32> -> vector<20x32xf32>
    %367 = arith.truncf %366 : vector<20x32xf32> to vector<20x32xbf16>
    %cst_125 = arith.constant dense<0.000000e+00> : vector<20x32xf32>
    %368 = tpu.matmul %367, %3, %cst_125 {dimension_numbers = #tpu.dot_dimension_numbers<[1], [0], [0], [1], [0, 0, 1, 1], [], []>} : vector<20x32xbf16>, vector<32x32xbf16>, vector<20x32xf32> -> vector<20x32xf32>
    %369 = vector.broadcast %6 : vector<1x32xf32> to vector<20x32xf32>
    %370 = arith.addf %368, %369 : vector<20x32xf32>
    %371 = arith.mulf %370, %370 : vector<20x32xf32>
    %372 = arith.mulf %370, %371 : vector<20x32xf32>
    %cst_126 = arith.constant 4.471500e-02 : f32
    %373 = vector.broadcast %cst_126 : f32 to vector<20x32xf32>
    %374 = arith.mulf %373, %372 : vector<20x32xf32>
    %375 = arith.addf %370, %374 : vector<20x32xf32>
    %cst_127 = arith.constant 0.797884583 : f32
    %376 = vector.broadcast %cst_127 : f32 to vector<20x32xf32>
    %377 = arith.mulf %376, %375 : vector<20x32xf32>
    %378 = math.tanh %377 : vector<20x32xf32>
    %cst_128 = arith.constant 1.000000e+00 : f32
    %379 = vector.broadcast %cst_128 : f32 to vector<20x32xf32>
    %380 = arith.addf %379, %378 : vector<20x32xf32>
    %cst_129 = arith.constant 5.000000e-01 : f32
    %381 = vector.broadcast %cst_129 : f32 to vector<20x32xf32>
    %382 = arith.mulf %381, %380 : vector<20x32xf32>
    %383 = arith.mulf %370, %382 : vector<20x32xf32>
    %384 = arith.truncf %383 : vector<20x32xf32> to vector<20x32xbf16>
    %cst_130 = arith.constant dense<0.000000e+00> : vector<20x16xf32>
    %385 = tpu.matmul %384, %4, %cst_130 {dimension_numbers = #tpu.dot_dimension_numbers<[1], [0], [0], [1], [0, 0, 1, 1], [], []>} : vector<20x32xbf16>, vector<32x16xbf16>, vector<20x16xf32> -> vector<20x16xf32>
    %386 = vector.broadcast %7 : vector<1x16xf32> to vector<20x16xf32>
    %387 = arith.addf %385, %386 : vector<20x16xf32>
    %388 = vector.broadcast %332 : f32 to vector<20x16xf32>
    %389 = arith.mulf %387, %388 : vector<20x16xf32>
    %390 = vector.broadcast %328 : f32 to vector<20x16xf32>
    %391 = arith.mulf %320, %390 : vector<20x16xf32>
    %392 = arith.addf %389, %391 : vector<20x16xf32>
    %393 = arith.subf %320, %392 : vector<20x16xf32>
    %394 = vector.broadcast %336 : f32 to vector<20x1xf32>
    %395 = arith.mulf %394, %0 : vector<20x1xf32>
    %396 = vector.broadcast %395 : vector<20x1xf32> to vector<20x16xf32>
    %397 = arith.mulf %393, %396 : vector<20x16xf32>
    %398 = arith.addf %320, %397 : vector<20x16xf32>
    %c5_i32 = arith.constant 5 : i32
    %c0_131 = arith.constant 0 : index
    %c0_132 = arith.constant 0 : index
    %399 = vector.load %arg11[%c0_131, %c0_132] : memref<20x16xf32, #tpu.memory_space<vmem>>, vector<20x16xf32>
    tpu.vector_store %arg11[%c0_131, %c0_132], %398 {strides = array<i32>} : memref<20x16xf32, #tpu.memory_space<vmem>>, vector<20x16xf32>,
    return
  }
}

</mosaic_0001>

<bundles_post_ra>
// kernel: tpu_custom_call.1
= control target key start
LH: loop header
LB: loop body
LE: loop exit
PB: predicated region body
PF: predicated region fallthrough
CT: control target
= control target key end

     0   :  { %16 = vsyncpa [#allocation3], 0  ;;  %s2770_s0 = inlined_call_operand.vmem [shape: f32[20], index: 0, kind: input, shape index: {}]   ;;  %s2771_s1 = inlined_call_operand.vmem [shape: f32[5,32], index: 1, kind: input, shape index: {}]   ;;  %s2772_s2 = inlined_call_operand.vmem [shape: f32[20,16], index: 2, kind: input, shape index: {}]   ;;  %s2773_s3 = inlined_call_operand.vmem [shape: f32[20,1], index: 3, kind: input, shape index: {}]   ;;  %s2774_s4 = inlined_call_operand.vmem [shape: bf16[16,32], index: 4, kind: input, shape index: {}]   ;;  %s2775_s5 = inlined_call_operand.vmem [shape: f32[1,32], index: 5, kind: input, shape index: {}]   ;;  %s2776_s6 = inlined_call_operand.vmem [shape: bf16[20,20], index: 6, kind: input, shape index: {}]   ;;  %s2777_s7 = inlined_call_operand.vmem [shape: bf16[32,32], index: 7, kind: input, shape index: {}]   ;;  %s2778_s8 = inlined_call_operand.vmem [shape: f32[1,32], index: 8, kind: input, shape index: {}]   ;;  %s2779_s9 = inlined_call_operand.vmem [shape: bf16[32,16], index: 9, kind: input, shape index: {}]   ;;  %s2780_s10 = inlined_call_operand.vmem [shape: f32[1,16], index: 10, kind: input, shape index: {}]   ;;  %s2781_s11 = inlined_call_operand.vmem [shape: f32[20,16], index: 11, kind: output, shape index: {}]  }
   0x1   :  { %s23_s19 = sshll.u32 %s2770_s0, 4  ;;  %s24_s19 = int_to_ptr.vmem [resolvable:$true] %s23_s19 }
   0x2   :  { %s2299_s20 = scalar_lea.vmem %s24_s19, 16  ;;  %p2304_p1 = scmp.lt.s32.totalorder %s24_s19, %s24_s19 }
   0x3   :  { %p2300_p0 = scmp.ne.s32.totalorder %s24_s19, %s2299_s20  ;;  %p2305_p2 = scmp.lt.s32.totalorder %s2299_s20, %s2299_s20 }
   0x5   :  { %p2306_p3 = por %p2305_p2, %p2304_p1 }
   0x7   :  { %p2307_p4 = pnand %p2306_p3, %p2300_p0 }
   0x9   :  { %2310 = shalt.err (!%p2307_p4)
}
   0xa   :  { %s2313_s21 = smov [#allocation2]  }
   0xb   :  { %26 = dma.vmem_to_smem %s24_s19, 16, %s2313_s21, [#allocation3]  }
   0xc   :  { %2311 = dma.done.wait [#allocation3], 16  }
   0xd   :  { %2312 = vsyncadd [#allocation3], 4294967280 }
   0xe   :  { %50 = sfence }
   0xf   :  { %s74_s22 = sld [smem:[#allocation2]]  ;;  %v2314_v0 = vmov 0   ;;  %s1911_s23 = sld [smem:[#allocation2 + $0x3]]  ;;  %v2381_v1 = vld [vmem:[%s2773_s3 + $0x10] sm:$0xf]  ;;  %v2386_v2 = vld [vmem:[%s2773_s3] sm:$0xff] }
  0x10   :  { %2221 = vset.pattern.permute.xlu1 %v2314_v0  ;;  %2220 = vset.pattern.permute.xlu0 %v2314_v0  ;;  %s1932_s24 = sld [smem:[#allocation2 + $0x4]]  ;;  %v2391_v3 = vld [vmem:[%s2773_s3 + $0x8] sm:$0xff]  ;;  %s1935_s13 = sld [smem:[#allocation2 + $0x7]]  ;;  %v2401_v15 = vld [vmem:[%s2774_s4] sm:$0xff]   ;;  %v2433_v60 = vld [vmem:[%s2772_s2 + $0x10] sm:$0xf] }
  0x11   :  { %s1946_s3 = sld [smem:[#allocation2 + $0x8]]  ;;  %2063 = vmatprep.subr.bf16.mxu0 %v2401_v15  ;;  %s1949_s17 = sld [smem:[#allocation2 + $0xb]]  ;;  %v2439_v0 = vld [vmem:[%s2772_s2] sm:$0xff]  ;;  %vm119_vm0 = vcmask 130048   ;;  %vm218_vm1 = vcmask 162816   ;;  %vm225_vm2 = vcmask 1041408  }
  0x12   :  { %2064 = vmatpush3.bf16.msra.mxu0 %v2401_v15  ;;  %s1960_s18 = sld [smem:[#allocation2 + $0xc]]  ;;  %s1963_s20 = sld [smem:[#allocation2 + $0xf]]  ;;  %vm297_vm3 = vcmask 261120   ;;  %vm1902_vm4 = vcmask 125952  }
  0x13   :  { %s1974_s21 = sld [smem:[#allocation2 + $0x10]]  ;;  %s1909_s25 = sld [smem:[#allocation2 + $0x1]] }
  0x14   :  { %s1910_s26 = sld [smem:[#allocation2 + $0x2]]  ;;  %s1947_s14 = sld [smem:[#allocation2 + $0x9]] }
  0x15   :  { %s1912_s28 = sadd.f32 -1.0, %s74_s22  ;;  %v467_v8 = vstv %s1911_s23  ;;  %s1977_s23 = sld [smem:[#allocation2 + $0x13]] }
  0x16   :  { %s1936_s12 = sadd.f32 -1.0, %s1932_s24  ;;  %v468_v11 = vmul.f32 %v467_v8, %v2386_v2  ;;  %v470_v14 = vmul.f32 %v467_v8, %v2381_v1  ;;  %v469_v16 = vmul.f32 %v467_v8, %v2391_v3  ;;  %v819_v22 = vstv %s1935_s13  ;;  %v2460_v8 = vld [vmem:[%s2777_s7] sm:$0xff]   ;;  %s1948_s15 = sld [smem:[#allocation2 + $0xa]] }
  0x17   :  { %v80_v4 = vstv %s1912_s28  ;;  %s1950_s16 = sadd.f32 -1.0, %s1946_s3  ;;  %v820_v23 = vmul.f32 %v819_v22, %v2386_v2  ;;  %v822_v26 = vmul.f32 %v819_v22, %v2381_v1  ;;  %v821_v27 = vmul.f32 %v819_v22, %v2391_v3  ;;  %2077 = vmatprep.subr.bf16.mxu0 %v2460_v8  ;;  %s1962_s24 = sld [smem:[#allocation2 + $0xe]] }
  0x18   :  { %v83_v5 = vmul.f32 %v80_v4, %v2381_v1  ;;  %v81_v6 = vmul.f32 %v80_v4, %v2386_v2  ;;  %v82_v7 = vmul.f32 %v80_v4, %v2391_v3  ;;  %v498_v13 = vstv %s1936_s12  ;;  %s1964_s19 = sadd.f32 -1.0, %s1960_s18  ;;  %s1934_s12 = sld [smem:[#allocation2 + $0x6]] }
  0x19   :  { %v500_v17 = vmul.f32 %v498_v13, %v2391_v3  ;;  %v499_v18 = vmul.f32 %v498_v13, %v2386_v2  ;;  %v501_v21 = vmul.f32 %v498_v13, %v2381_v1  ;;  %v850_v25 = vstv %s1950_s16  ;;  %s1978_s22 = sadd.f32 -1.0, %s1974_s21 }
  0x1a   :  { %v86_v9 = vadd.f32 1.0, %v83_v5  ;;  %v84_v10 = vadd.f32 1.0, %v81_v6  ;;  %v85_v12 = vadd.f32 1.0, %v82_v7  ;;  %v852_v28 = vmul.f32 %v850_v25, %v2391_v3  ;;  %v2453_v7 = vld [vmem:[%s2776_s6] sm:$0xff]  }
  0x1b   :  { %v503_v19 = vadd.f32 1.0, %v500_v17  ;;  %v502_v20 = vadd.f32 1.0, %v499_v18  ;;  %v504_v24 = vadd.f32 1.0, %v501_v21  ;;  %v851_v29 = vmul.f32 %v850_v25, %v2386_v2  ;;  %2073 = vmatprep.mubr.msk.bf16.mxu1 %vm218_vm1, %v2453_v7 }
  0x1c   :  { %99 = vperm.xlu1 %2221, %v86_v9   ;;  %89 = vperm.xlu0 %2220, %v84_v10   ;;  %v855_v30 = vadd.f32 1.0, %v852_v28  ;;  %v853_v32 = vmul.f32 %v850_v25, %v2381_v1  ;;  %v1171_v33 = vstv %s1949_s17  ;;  %v1202_v36 = vstv %s1964_s19  ;;  %v2467_v9 = vld [vmem:[%s2775_s5] ss:$0 sm:$0xff] }
  0x1d   :  { %v854_v31 = vadd.f32 1.0, %v851_v29  ;;  %v1172_v34 = vmul.f32 %v1171_v33, %v2386_v2  ;;  %v1174_v37 = vmul.f32 %v1171_v33, %v2381_v1  ;;  %v1173_v38 = vmul.f32 %v1171_v33, %v2391_v3  ;;  %v1917_v10 = vld [vmem:[%s2771_s1] ss:$0 sm:$0xff] }
  0x1e   :  { %v856_v35 = vadd.f32 1.0, %v853_v32  ;;  %v1204_v39 = vmul.f32 %v1202_v36, %v2391_v3  ;;  %v1203_v40 = vmul.f32 %v1202_v36, %v2386_v2  ;;  %v1205_v43 = vmul.f32 %v1202_v36, %v2381_v1 }
  0x1f   :  { %v1523_v44 = vstv %s1963_s20  ;;  %v1554_v47 = vstv %s1978_s22  ;;  %v1875_v55 = vstv %s1977_s23  ;;  %s1961_s23 = sld [smem:[#allocation2 + $0xd]] }
  0x20   :  { %473 = vperm.xlu1 %2221, %v468_v11   ;;  %94 = vperm.xlu0 %2220, %v85_v12   ;;  %v1207_v41 = vadd.f32 1.0, %v1204_v39  ;;  %v1206_v42 = vadd.f32 1.0, %v1203_v40  ;;  %v1524_v45 = vmul.f32 %v1523_v44, %v2386_v2  ;;  %v1208_v46 = vadd.f32 1.0, %v1205_v43 }
  0x21   :  { %v1526_v48 = vmul.f32 %v1523_v44, %v2381_v1  ;;  %v1525_v49 = vmul.f32 %v1523_v44, %v2391_v3  ;;  %v1556_v50 = vmul.f32 %v1554_v47, %v2391_v3  ;;  %v1555_v51 = vmul.f32 %v1554_v47, %v2386_v2 }
  0x22   :  { %v1557_v54 = vmul.f32 %v1554_v47, %v2381_v1  ;;  %v1876_v56 = vmul.f32 %v1875_v55, %v2386_v2  ;;  %v1878_v58 = vmul.f32 %v1875_v55, %v2381_v1  ;;  %v1877_v59 = vmul.f32 %v1875_v55, %v2391_v3  ;;  %v2444_v1 = vld [vmem:[%s2772_s2 + $0x8] sm:$0xff]  ;;  %s1933_s2 = sld [smem:[#allocation2 + $0x5]] }
  0x23   :  { %v1559_v52 = vadd.f32 1.0, %v1556_v50  ;;  %v1558_v53 = vadd.f32 1.0, %v1555_v51 }
  0x24   :  { %483 = vperm.xlu1 %2221, %v470_v14   ;;  %478 = vperm.xlu0 %2220, %v469_v16   ;;  %v1560_v57 = vadd.f32 1.0, %v1557_v54 }
  0x28   :  { %512 = vperm.xlu1 %2221, %v503_v19   ;;  %507 = vperm.xlu0 %2220, %v502_v20  }
  0x2c   :  { %825 = vperm.xlu1 %2221, %v820_v23   ;;  %517 = vperm.xlu0 %2220, %v504_v24  }
  0x30   :  { %835 = vperm.xlu1 %2221, %v822_v26   ;;  %830 = vperm.xlu0 %2220, %v821_v27  }
  0x34   :  { %864 = vperm.xlu1 %2221, %v855_v30   ;;  %859 = vperm.xlu0 %2220, %v854_v31  }
  0x38   :  { %1177 = vperm.xlu1 %2221, %v1172_v34   ;;  %869 = vperm.xlu0 %2220, %v856_v35  }
  0x3c   :  { %1187 = vperm.xlu1 %2221, %v1174_v37   ;;  %1182 = vperm.xlu0 %2220, %v1173_v38  }
  0x40   :  { %1216 = vperm.xlu1 %2221, %v1207_v41   ;;  %1211 = vperm.xlu0 %2220, %v1206_v42  }
  0x44   :  { %1529 = vperm.xlu1 %2221, %v1524_v45   ;;  %1221 = vperm.xlu0 %2220, %v1208_v46  }
  0x48   :  { %1539 = vperm.xlu1 %2221, %v1526_v48   ;;  %1534 = vperm.xlu0 %2220, %v1525_v49  }
  0x4c   :  { %1568 = vperm.xlu1 %2221, %v1559_v52   ;;  %1563 = vperm.xlu0 %2220, %v1558_v53   ;;  %v2480_v52 = vld [vmem:[%s2776_s6 + $0x8] ss:$0 sps:$4 sm:$0x33]  }
  0x4d   :  { %v2487_v53 = vld [vmem:[%s2777_s7 + $0x8] sm:$0xff]  }
  0x50   :  { %1881 = vperm.xlu1 %2221, %v1876_v56   ;;  %1573 = vperm.xlu0 %2220, %v1560_v57  }
  0x54   :  { %1891 = vperm.xlu1 %2221, %v1878_v58   ;;  %1886 = vperm.xlu0 %2220, %v1877_v59  }
  0x9b   :  { %v90_v61 = vpop.permute.xlu0 %89  ;;  %v100_v62 = vpop.permute.xlu1 %99 }
  0x9c   :  { %v104_v63 = vmul.f32 %v100_v62, %v2433_v60  ;;  %v102_v3 = vmul.f32 %v90_v61, %v2439_v0  ;;  %v2499_v61 = vld [vmem:[%s2779_s9] sm:$0xff]   ;;  %v2506_v62 = vld [vmem:[%s2779_s9 + $0x8] sm:$0xff]  }
  0x9e   :  { %v106_v5 = vpack.c.bf16 %v104_v63, %v104_v63  ;;  %v2513_v63 = vld [vmem:[%s2778_s8] ss:$0 sm:$0xff] }
  0x9f   :  { %v95_v2 = vpop.permute.xlu0 %94 }
  0xa0   :  { %v103_v4 = vmul.f32 %v95_v2, %v2444_v1 }
  0xa2   :  { %v105_v6 = vpack.c.bf16 %v103_v4, %v102_v3 }
  0xa4   :  { %2065 = vmatprep.mubr.msk.bf16.mxu0 %vm119_vm0, %v105_v6 }
  0xa5   :  { %2066 = vmatmul.mubr.msk.bf16.vlgmr.msra.gmra.mrb[0].mxu0 %vm119_vm0, %v106_v5 }
  0xa6   :  { %2078 = vmatpush3.bf16.msra.mxu0 %v2460_v8 }
  0xa7   :  { %2079 = vmatprep.subr.bf16.mxu0 %v2487_v53 }
  0xaa   :  { %2080 = vmatpush3.bf16.msra.mxu0 %v2487_v53 }
  0xab   :  { %2093 = vmatprep.subr.bf16.mxu0 %v2401_v15 }
 0x178   :  { %v2067_v11 = vpop.f32.mrb[0].mxu0 }
 0x179   :  { %v169_v12 = vadd.f32 %v2067_v11, %v2467_v9  ;;  %v160_v13 = vpop.f32.mrb[1].mxu0 }
 0x17a   :  { %v161_v14 = vadd.f32 %v2467_v9, %v160_v13  ;;  %v2068_v16 = vpop.f32.mrb[2].mxu0 }
 0x17b   :  { %v180_v17 = vadd.f32 %v1917_v10, %v169_v12  ;;  %v163_v18 = vpop.f32.mrb[3].mxu0 }
 0x17c   :  { %v178_v19 = vadd.f32 %v1917_v10, %v161_v14  ;;  %v164_v20 = vadd.f32 %v2467_v9, %v163_v18 }
 0x17d   :  { %v183_v21 = vmul.f32 %v180_v17, %v180_v17 }
 0x17e   :  { %v181_v22 = vmul.f32 %v178_v19, %v178_v19  ;;  %v179_v23 = vadd.f32 %v1917_v10, %v164_v20 }
 0x17f   :  { %v186_v24 = vmul.f32 %v183_v21, %v180_v17 }
 0x180   :  { %v184_v25 = vmul.f32 %v181_v22, %v178_v19  ;;  %v182_v26 = vmul.f32 %v179_v23, %v179_v23 }
 0x181   :  { %v189_v27 = vmul.f32 0.044715, %v186_v24 }
 0x182   :  { %v187_v28 = vmul.f32 0.044715, %v184_v25  ;;  %v185_v29 = vmul.f32 %v182_v26, %v179_v23 }
 0x183   :  { %v192_v30 = vadd.f32 %v189_v27, %v180_v17 }
 0x184   :  { %v188_v31 = vmul.f32 0.044715, %v185_v29  ;;  %v190_v32 = vadd.f32 %v187_v28, %v178_v19 }
 0x185   :  { %v195_v33 = vmul.f32 0.7978846, %v192_v30 }
 0x186   :  { %v191_v34 = vadd.f32 %v188_v31, %v179_v23  ;;  %v193_v35 = vmul.f32 0.7978846, %v190_v32 }
 0x187   :  { %2229 = vtanh.f32 %v195_v33 }
 0x188   :  { %v194_v36 = vmul.f32 0.7978846, %v191_v34  ;;  %2231 = vtanh.f32 %v193_v35 }
 0x18a   :  { %2233 = vtanh.f32 %v194_v36 }
 0x191   :  { %v2230_v37 = vpop.eup %2229 }
 0x192   :  { %v2232_v38 = vpop.eup %2231  ;;  %v201_v39 = vadd.f32 1.0, %v2230_v37 }
 0x193   :  { %v199_v40 = vadd.f32 1.0, %v2232_v38 }
 0x194   :  { %v2234_v41 = vpop.eup %2233  ;;  %v204_v44 = vmul.f32 0.5, %v201_v39 }
 0x195   :  { %v200_v42 = vadd.f32 1.0, %v2234_v41  ;;  %v202_v43 = vmul.f32 0.5, %v199_v40 }
 0x196   :  { %v207_v48 = vmul.f32 %v204_v44, %v180_v17 }
 0x197   :  { %v203_v45 = vmul.f32 0.5, %v200_v42  ;;  %v205_v46 = vmul.f32 %v202_v43, %v178_v19  ;;  %v2525_v42 = vld [vmem:[%s2780_s10] ss:$0 sm:$0xff]  ;;  %v457_v43 = vstv %s1909_s25 }
 0x198   :  { %v209_v50 = vpack.c.bf16 %v207_v48, %v207_v48  ;;  %v460_v48 = vmul.f32 %v457_v43, %v2433_v60 }
 0x199   :  { %v206_v47 = vmul.f32 %v203_v45, %v179_v23  ;;  %v453_v45 = vstv %s1910_s26 }
 0x19a   :  { %v227_v51 = vsel %vm225_vm2, %v209_v50, 0 }
 0x19b   :  { %v208_v49 = vpack.c.bf16 %v206_v47, %v205_v46  ;;  %v474_v46 = vpop.permute.xlu1 %473 }
 0x19d   :  { %2069 = vmatprep.subr.bf16.mxu1 %v208_v49 }
 0x19e   :  { %2070 = vmatpush3.bf16.msra.mxu1 %v208_v49 }
 0x19f   :  { %2213 = vmatprep.subr.msk.bf16.mxu1 %vm225_vm2, %v209_v50  ;;  %v479_v50 = vpop.permute.xlu0 %478 }
 0x1a2   :  { %2072 = vmatpush3.bf16.msra.mxu1 %v227_v51 }
 0x1a3   :  { %2085 = vmatprep.subr.bf16.mxu1 %v2499_v61 }
 0x1a5   :  { %2074 = vmatmul.mubr.msk.bf16.vlgmr.msra.gmra.mrb[0].mxu1 %vm218_vm1, %v2480_v52 }
 0x1a6   :  { %2086 = vmatpush3.bf16.msra.mxu1 %v2499_v61 }
 0x1a7   :  { %2087 = vmatprep.subr.bf16.mxu1 %v2506_v62 }
 0x1aa   :  { %2088 = vmatpush3.bf16.msra.mxu1 %v2506_v62 }
 0x278   :  { %v2075_v54 = vpop.f32.mrb[0].mxu1 }
 0x279   :  { %v263_v55 = vpop.f32.mrb[1].mxu1  ;;  %v278_v59 = vpack.c.bf16 %v2075_v54, %v2075_v54  ;;  %v458_v54 = vmul.f32 %v457_v43, %v2439_v0 }
 0x27a   :  { %v2076_v56 = vpop.f32.mrb[2].mxu1 }
 0x27b   :  { %v266_v57 = vpop.f32.mrb[3].mxu1 }
 0x27c   :  { %v277_v58 = vpack.c.bf16 %v266_v57, %v263_v55 }
 0x27e   :  { %2081 = vmatprep.mubr.msk.bf16.mxu0 %vm297_vm3, %v277_v58 }
 0x27f   :  { %2082 = vmatmul.mubr.msk.bf16.vlgmr.msra.gmra.mrb[4].mxu0 %vm297_vm3, %v278_v59 }
 0x280   :  { %2094 = vmatpush3.bf16.msra.mxu0 %v2401_v15 }
 0x281   :  { %2107 = vmatprep.subr.bf16.mxu0 %v2460_v8 }
 0x352   :  { %v2083_v2 = vpop.f32.mrb[4].mxu0 }
 0x353   :  { %v347_v3 = vadd.f32 %v2083_v2, %v2513_v63  ;;  %v338_v4 = vpop.f32.mrb[5].mxu0  ;;  %v459_v2 = vmul.f32 %v457_v43, %v2444_v1 }
 0x354   :  { %v339_v5 = vadd.f32 %v2513_v63, %v338_v4  ;;  %v2084_v6 = vpop.f32.mrb[6].mxu0 }
 0x355   :  { %v354_v10 = vmul.f32 %v347_v3, %v347_v3  ;;  %v341_v11 = vpop.f32.mrb[7].mxu0 }
 0x356   :  { %v352_v12 = vmul.f32 %v339_v5, %v339_v5  ;;  %v342_v13 = vadd.f32 %v2513_v63, %v341_v11  ;;  %v508_v11 = vpop.permute.xlu0 %507 }
 0x357   :  { %v357_v14 = vmul.f32 %v354_v10, %v347_v3  ;;  %v484_v10 = vpop.permute.xlu1 %483 }
 0x358   :  { %v355_v16 = vmul.f32 %v352_v12, %v339_v5  ;;  %v353_v17 = vmul.f32 %v342_v13, %v342_v13 }
 0x359   :  { %v360_v18 = vmul.f32 0.044715, %v357_v14 }
 0x35a   :  { %v358_v19 = vmul.f32 0.044715, %v355_v16  ;;  %v356_v20 = vmul.f32 %v353_v17, %v342_v13 }
 0x35b   :  { %v363_v21 = vadd.f32 %v360_v18, %v347_v3 }
 0x35c   :  { %v361_v22 = vadd.f32 %v358_v19, %v339_v5  ;;  %v359_v23 = vmul.f32 0.044715, %v356_v20 }
 0x35d   :  { %v366_v24 = vmul.f32 0.7978846, %v363_v21  ;;  %v518_v21 = vpop.permute.xlu0 %517 }
 0x35e   :  { %v364_v25 = vmul.f32 0.7978846, %v361_v22  ;;  %v362_v26 = vadd.f32 %v359_v23, %v342_v13  ;;  %v513_v23 = vpop.permute.xlu1 %512 }
 0x35f   :  { %2235 = vtanh.f32 %v366_v24 }
 0x360   :  { %2237 = vtanh.f32 %v364_v25  ;;  %v365_v27 = vmul.f32 0.7978846, %v362_v26 }
 0x362   :  { %2239 = vtanh.f32 %v365_v27 }
 0x369   :  { %v2236_v28 = vpop.eup %2235 }
 0x36a   :  { %v2238_v29 = vpop.eup %2237  ;;  %v372_v30 = vadd.f32 1.0, %v2236_v28 }
 0x36b   :  { %v370_v31 = vadd.f32 1.0, %v2238_v29 }
 0x36c   :  { %v2240_v32 = vpop.eup %2239  ;;  %v375_v33 = vmul.f32 0.5, %v372_v30 }
 0x36d   :  { %v373_v34 = vmul.f32 0.5, %v370_v31  ;;  %v371_v35 = vadd.f32 1.0, %v2240_v32 }
 0x36e   :  { %v378_v37 = vmul.f32 %v375_v33, %v347_v3 }
 0x36f   :  { %v374_v36 = vmul.f32 0.5, %v371_v35  ;;  %v376_v38 = vmul.f32 %v373_v34, %v339_v5 }
 0x370   :  { %v380_v41 = vpack.c.bf16 %v378_v37, %v378_v37 }
 0x371   :  { %v377_v39 = vmul.f32 %v374_v36, %v342_v13 }
 0x373   :  { %v379_v40 = vpack.c.bf16 %v377_v39, %v376_v38 }
 0x375   :  { %2089 = vmatprep.mubr.msk.bf16.mxu1 %vm297_vm3, %v379_v40 }
 0x376   :  { %2090 = vmatmul.mubr.msk.bf16.vlgmr.msra.gmra.mrb[4].mxu1 %vm297_vm3, %v380_v41 }
 0x377   :  { %2103 = vmatprep.mubr.msk.bf16.mxu1 %vm218_vm1, %v2453_v7 }
 0x449   :  { %v2091_v44 = vpop.f32.mrb[4].mxu1 }
 0x44a   :  { %v448_v47 = vadd.f32 %v2091_v44, %v2525_v42  ;;  %v439_v49 = vpop.f32.mrb[5].mxu1 }
 0x44b   :  { %v440_v51 = vadd.f32 %v2525_v42, %v439_v49  ;;  %v2092_v55 = vpop.f32.mrb[6].mxu1 }
 0x44c   :  { %v456_v56 = vmul.f32 %v453_v45, %v448_v47  ;;  %v442_v57 = vpop.f32.mrb[7].mxu1 }
 0x44d   :  { %v454_v58 = vmul.f32 %v453_v45, %v440_v51  ;;  %v443_v59 = vadd.f32 %v2525_v42, %v442_v57 }
 0x44e   :  { %v463_v3 = vadd.f32 %v460_v48, %v456_v56 }
 0x44f   :  { %v461_v4 = vadd.f32 %v458_v54, %v454_v58  ;;  %v455_v5 = vmul.f32 %v453_v45, %v443_v59 }
 0x450   :  { %v466_v6 = vsub.f32 %v2433_v60, %v463_v3 }
 0x451   :  { %v464_v12 = vsub.f32 %v2439_v0, %v461_v4  ;;  %v462_v13 = vadd.f32 %v459_v2, %v455_v5 }
 0x452   :  { %v488_v14 = vmul.f32 %v484_v10, %v466_v6 }
 0x453   :  { %v486_v16 = vmul.f32 %v474_v46, %v464_v12  ;;  %v465_v17 = vsub.f32 %v2444_v1, %v462_v13 }
 0x454   :  { %v2537_v18 = vadd.f32 %v488_v14, %v2433_v60  ;;  %v1939_v60 = vld [vmem:[%s2771_s1 + $0x1] ss:$0 sm:$0xff] }
 0x455   :  { %v2540_v19 = vadd.f32 %v486_v16, %v2439_v0  ;;  %v487_v20 = vmul.f32 %v479_v50, %v465_v17 }
 0x456   :  { %v522_v24 = vmul.f32 %v518_v21, %v2537_v18 }
 0x457   :  { %v2543_v22 = vadd.f32 %v487_v20, %v2444_v1  ;;  %v520_v25 = vmul.f32 %v508_v11, %v2540_v19 }
 0x458   :  { %v524_v28 = vpack.c.bf16 %v522_v24, %v522_v24 }
 0x459   :  { %v521_v26 = vmul.f32 %v513_v23, %v2543_v22 }
 0x45b   :  { %v523_v27 = vpack.c.bf16 %v521_v26, %v520_v25 }
 0x45d   :  { %2095 = vmatprep.mubr.msk.bf16.mxu0 %vm119_vm0, %v523_v27 }
 0x45e   :  { %2096 = vmatmul.mubr.msk.bf16.vlgmr.msra.gmra.mrb[8].mxu0 %vm119_vm0, %v524_v28 }
 0x45f   :  { %2108 = vmatpush3.bf16.msra.mxu0 %v2460_v8 }
 0x460   :  { %2109 = vmatprep.subr.bf16.mxu0 %v2487_v53 }
 0x463   :  { %2110 = vmatpush3.bf16.msra.mxu0 %v2487_v53 }
 0x464   :  { %2123 = vmatprep.subr.bf16.mxu0 %v2401_v15 }
 0x531   :  { %v2097_v0 = vpop.f32.mrb[8].mxu0 }
 0x532   :  { %v574_v1 = vadd.f32 %v2097_v0, %v2467_v9  ;;  %v565_v29 = vpop.f32.mrb[9].mxu0 }
 0x533   :  { %v566_v30 = vadd.f32 %v2467_v9, %v565_v29  ;;  %v2098_v31 = vpop.f32.mrb[10].mxu0 }
 0x534   :  { %v585_v32 = vadd.f32 %v1939_v60, %v574_v1  ;;  %v568_v33 = vpop.f32.mrb[11].mxu0 }
 0x535   :  { %v583_v34 = vadd.f32 %v1939_v60, %v566_v30  ;;  %v569_v35 = vadd.f32 %v2467_v9, %v568_v33 }
 0x536   :  { %v588_v36 = vmul.f32 %v585_v32, %v585_v32 }
 0x537   :  { %v586_v37 = vmul.f32 %v583_v34, %v583_v34  ;;  %v584_v38 = vadd.f32 %v1939_v60, %v569_v35 }
 0x538   :  { %v591_v39 = vmul.f32 %v588_v36, %v585_v32 }
 0x539   :  { %v589_v40 = vmul.f32 %v586_v37, %v583_v34  ;;  %v587_v41 = vmul.f32 %v584_v38, %v584_v38 }
 0x53a   :  { %v594_v43 = vmul.f32 0.044715, %v591_v39 }
 0x53b   :  { %v592_v44 = vmul.f32 0.044715, %v589_v40  ;;  %v590_v45 = vmul.f32 %v587_v41, %v584_v38 }
 0x53c   :  { %v597_v46 = vadd.f32 %v594_v43, %v585_v32 }
 0x53d   :  { %v595_v47 = vadd.f32 %v592_v44, %v583_v34  ;;  %v593_v48 = vmul.f32 0.044715, %v590_v45 }
 0x53e   :  { %v600_v49 = vmul.f32 0.7978846, %v597_v46 }
 0x53f   :  { %v598_v50 = vmul.f32 0.7978846, %v595_v47  ;;  %v596_v51 = vadd.f32 %v593_v48, %v584_v38 }
 0x540   :  { %2241 = vtanh.f32 %v600_v49 }
 0x541   :  { %v599_v54 = vmul.f32 0.7978846, %v596_v51  ;;  %2243 = vtanh.f32 %v598_v50 }
 0x543   :  { %2245 = vtanh.f32 %v599_v54 }
 0x54a   :  { %v2242_v55 = vpop.eup %2241 }
 0x54b   :  { %v2244_v56 = vpop.eup %2243  ;;  %v606_v57 = vadd.f32 1.0, %v2242_v55 }
 0x54c   :  { %v604_v58 = vadd.f32 1.0, %v2244_v56 }
 0x54d   :  { %v2246_v59 = vpop.eup %2245  ;;  %v609_v4 = vmul.f32 0.5, %v606_v57 }
 0x54e   :  { %v605_v2 = vadd.f32 1.0, %v2246_v59  ;;  %v607_v3 = vmul.f32 0.5, %v604_v58 }
 0x54f   :  { %v612_v11 = vmul.f32 %v609_v4, %v585_v32  ;;  %v805_v4 = vstv %s1934_s12 }
 0x550   :  { %v608_v5 = vmul.f32 0.5, %v605_v2  ;;  %v610_v6 = vmul.f32 %v607_v3, %v583_v34 }
 0x551   :  { %v614_v13 = vpack.c.bf16 %v612_v11, %v612_v11 }
 0x552   :  { %v611_v10 = vmul.f32 %v608_v5, %v584_v38  ;;  %v809_v5 = vstv %s1933_s2 }
 0x553   :  { %v616_v14 = vsel %vm225_vm2, %v614_v13, 0 }
 0x554   :  { %v613_v12 = vpack.c.bf16 %v611_v10, %v610_v6  ;;  %v826_v6 = vpop.permute.xlu1 %825 }
 0x556   :  { %2099 = vmatprep.subr.bf16.mxu1 %v613_v12 }
 0x557   :  { %2100 = vmatpush3.bf16.msra.mxu1 %v613_v12  ;;  %v831_v12 = vpop.permute.xlu0 %830 }
 0x558   :  { %2214 = vmatprep.subr.msk.bf16.mxu1 %vm225_vm2, %v614_v13 }
 0x55b   :  { %2102 = vmatpush3.bf16.msra.mxu1 %v616_v14 }
 0x55c   :  { %2115 = vmatprep.subr.bf16.mxu1 %v2499_v61 }
 0x55e   :  { %2104 = vmatmul.mubr.msk.bf16.vlgmr.msra.gmra.mrb[8].mxu1 %vm218_vm1, %v2480_v52 }
 0x55f   :  { %2116 = vmatpush3.bf16.msra.mxu1 %v2499_v61 }
 0x560   :  { %2117 = vmatprep.subr.bf16.mxu1 %v2506_v62 }
 0x563   :  { %2118 = vmatpush3.bf16.msra.mxu1 %v2506_v62 }
 0x631   :  { %v2105_v16 = vpop.f32.mrb[8].mxu1 }
 0x632   :  { %v652_v17 = vpop.f32.mrb[9].mxu1  ;;  %v667_v24 = vpack.c.bf16 %v2105_v16, %v2105_v16 }
 0x633   :  { %v2106_v20 = vpop.f32.mrb[10].mxu1 }
 0x634   :  { %v655_v21 = vpop.f32.mrb[11].mxu1 }
 0x635   :  { %v666_v23 = vpack.c.bf16 %v655_v21, %v652_v17  ;;  %v812_v17 = vmul.f32 %v809_v5, %v2537_v18 }
 0x637   :  { %2111 = vmatprep.mubr.msk.bf16.mxu0 %vm297_vm3, %v666_v23  ;;  %v810_v23 = vmul.f32 %v809_v5, %v2540_v19 }
 0x638   :  { %2112 = vmatmul.mubr.msk.bf16.vlgmr.msra.gmra.mrb[12].mxu0 %vm297_vm3, %v667_v24 }
 0x639   :  { %2124 = vmatpush3.bf16.msra.mxu0 %v2401_v15 }
 0x63a   :  { %2137 = vmatprep.subr.bf16.mxu0 %v2460_v8 }
 0x70b   :  { %v2113_v25 = vpop.f32.mrb[12].mxu0 }
 0x70c   :  { %v717_v26 = vadd.f32 %v2113_v25, %v2513_v63  ;;  %v708_v27 = vpop.f32.mrb[13].mxu0 }
 0x70d   :  { %v709_v28 = vadd.f32 %v2513_v63, %v708_v27  ;;  %v2114_v60 = vpop.f32.mrb[14].mxu0 }
 0x70e   :  { %v724_v0 = vmul.f32 %v717_v26, %v717_v26  ;;  %v711_v1 = vpop.f32.mrb[15].mxu0 }
 0x70f   :  { %v722_v29 = vmul.f32 %v709_v28, %v709_v28  ;;  %v712_v30 = vadd.f32 %v2513_v63, %v711_v1  ;;  %v860_v1 = vpop.permute.xlu0 %859 }
 0x710   :  { %v727_v31 = vmul.f32 %v724_v0, %v717_v26  ;;  %v836_v0 = vpop.permute.xlu1 %835 }
 0x711   :  { %v725_v32 = vmul.f32 %v722_v29, %v709_v28  ;;  %v723_v33 = vmul.f32 %v712_v30, %v712_v30 }
 0x712   :  { %v730_v34 = vmul.f32 0.044715, %v727_v31 }
 0x713   :  { %v728_v35 = vmul.f32 0.044715, %v725_v32  ;;  %v726_v36 = vmul.f32 %v723_v33, %v712_v30 }
 0x714   :  { %v733_v37 = vadd.f32 %v730_v34, %v717_v26 }
 0x715   :  { %v731_v38 = vadd.f32 %v728_v35, %v709_v28  ;;  %v729_v39 = vmul.f32 0.044715, %v726_v36 }
 0x716   :  { %v736_v40 = vmul.f32 0.7978846, %v733_v37  ;;  %v870_v37 = vpop.permute.xlu0 %869 }
 0x717   :  { %v734_v41 = vmul.f32 0.7978846, %v731_v38  ;;  %v732_v43 = vadd.f32 %v729_v39, %v712_v30  ;;  %v865_v39 = vpop.permute.xlu1 %864 }
 0x718   :  { %2247 = vtanh.f32 %v736_v40 }
 0x719   :  { %2249 = vtanh.f32 %v734_v41  ;;  %v735_v44 = vmul.f32 0.7978846, %v732_v43 }
 0x71b   :  { %2251 = vtanh.f32 %v735_v44 }
 0x722   :  { %v2248_v45 = vpop.eup %2247 }
 0x723   :  { %v2250_v46 = vpop.eup %2249  ;;  %v742_v47 = vadd.f32 1.0, %v2248_v45 }
 0x724   :  { %v740_v48 = vadd.f32 1.0, %v2250_v46 }
 0x725   :  { %v2252_v49 = vpop.eup %2251  ;;  %v745_v50 = vmul.f32 0.5, %v742_v47 }
 0x726   :  { %v743_v51 = vmul.f32 0.5, %v740_v48  ;;  %v741_v54 = vadd.f32 1.0, %v2252_v49 }
 0x727   :  { %v748_v56 = vmul.f32 %v745_v50, %v717_v26 }
 0x728   :  { %v744_v55 = vmul.f32 0.5, %v741_v54  ;;  %v746_v57 = vmul.f32 %v743_v51, %v709_v28  ;;  %v811_v28 = vmul.f32 %v809_v5, %v2543_v22 }
 0x729   :  { %v750_v2 = vpack.c.bf16 %v748_v56, %v748_v56 }
 0x72a   :  { %v747_v58 = vmul.f32 %v744_v55, %v712_v30 }
 0x72c   :  { %v749_v59 = vpack.c.bf16 %v747_v58, %v746_v57 }
 0x72e   :  { %2119 = vmatprep.mubr.msk.bf16.mxu1 %vm297_vm3, %v749_v59 }
 0x72f   :  { %2120 = vmatmul.mubr.msk.bf16.vlgmr.msra.gmra.mrb[12].mxu1 %vm297_vm3, %v750_v2 }
 0x730   :  { %2133 = vmatprep.mubr.msk.bf16.mxu1 %vm218_vm1, %v2453_v7 }
 0x802   :  { %v2121_v3 = vpop.f32.mrb[12].mxu1 }
 0x803   :  { %v800_v10 = vadd.f32 %v2121_v3, %v2525_v42  ;;  %v791_v11 = vpop.f32.mrb[13].mxu1 }
 0x804   :  { %v792_v13 = vadd.f32 %v2525_v42, %v791_v11  ;;  %v2122_v14 = vpop.f32.mrb[14].mxu1 }
 0x805   :  { %v808_v16 = vmul.f32 %v805_v4, %v800_v10  ;;  %v794_v20 = vpop.f32.mrb[15].mxu1 }
 0x806   :  { %v806_v21 = vmul.f32 %v805_v4, %v792_v13  ;;  %v795_v24 = vadd.f32 %v2525_v42, %v794_v20 }
 0x807   :  { %v815_v25 = vadd.f32 %v812_v17, %v808_v16 }
 0x808   :  { %v813_v26 = vadd.f32 %v810_v23, %v806_v21  ;;  %v807_v27 = vmul.f32 %v805_v4, %v795_v24 }
 0x809   :  { %v818_v60 = vsub.f32 %v2537_v18, %v815_v25 }
 0x80a   :  { %v816_v29 = vsub.f32 %v2540_v19, %v813_v26  ;;  %v814_v30 = vadd.f32 %v811_v28, %v807_v27 }
 0x80b   :  { %v840_v31 = vmul.f32 %v836_v0, %v818_v60 }
 0x80c   :  { %v838_v32 = vmul.f32 %v826_v6, %v816_v29  ;;  %v817_v33 = vsub.f32 %v2543_v22, %v814_v30 }
 0x80d   :  { %v2589_v34 = vadd.f32 %v840_v31, %v2537_v18  ;;  %v1953_v18 = vld [vmem:[%s2771_s1 + $0x2] ss:$0 sm:$0xff] }
 0x80e   :  { %v2592_v35 = vadd.f32 %v838_v32, %v2540_v19  ;;  %v839_v36 = vmul.f32 %v831_v12, %v817_v33 }
 0x80f   :  { %v874_v40 = vmul.f32 %v870_v37, %v2589_v34 }
 0x810   :  { %v2595_v38 = vadd.f32 %v839_v36, %v2543_v22  ;;  %v872_v41 = vmul.f32 %v860_v1, %v2592_v35 }
 0x811   :  { %v876_v45 = vpack.c.bf16 %v874_v40, %v874_v40 }
 0x812   :  { %v873_v43 = vmul.f32 %v865_v39, %v2595_v38 }
 0x814   :  { %v875_v44 = vpack.c.bf16 %v873_v43, %v872_v41 }
 0x816   :  { %2125 = vmatprep.mubr.msk.bf16.mxu0 %vm119_vm0, %v875_v44 }
 0x817   :  { %2126 = vmatmul.mubr.msk.bf16.vlgmr.msra.gmra.mrb[16].mxu0 %vm119_vm0, %v876_v45 }
 0x818   :  { %2138 = vmatpush3.bf16.msra.mxu0 %v2460_v8 }
 0x819   :  { %2139 = vmatprep.subr.bf16.mxu0 %v2487_v53 }
 0x81c   :  { %2140 = vmatpush3.bf16.msra.mxu0 %v2487_v53 }
 0x81d   :  { %2153 = vmatprep.subr.bf16.mxu0 %v2401_v15 }
 0x8ea   :  { %v2127_v19 = vpop.f32.mrb[16].mxu0 }
 0x8eb   :  { %v926_v22 = vadd.f32 %v2127_v19, %v2467_v9  ;;  %v917_v46 = vpop.f32.mrb[17].mxu0 }
 0x8ec   :  { %v918_v47 = vadd.f32 %v2467_v9, %v917_v46  ;;  %v2128_v48 = vpop.f32.mrb[18].mxu0 }
 0x8ed   :  { %v937_v49 = vadd.f32 %v1953_v18, %v926_v22  ;;  %v920_v50 = vpop.f32.mrb[19].mxu0 }
 0x8ee   :  { %v935_v51 = vadd.f32 %v1953_v18, %v918_v47  ;;  %v921_v54 = vadd.f32 %v2467_v9, %v920_v50 }
 0x8ef   :  { %v940_v55 = vmul.f32 %v937_v49, %v937_v49 }
 0x8f0   :  { %v938_v56 = vmul.f32 %v935_v51, %v935_v51  ;;  %v936_v57 = vadd.f32 %v1953_v18, %v921_v54 }
 0x8f1   :  { %v943_v58 = vmul.f32 %v940_v55, %v937_v49 }
 0x8f2   :  { %v941_v59 = vmul.f32 %v938_v56, %v935_v51  ;;  %v939_v2 = vmul.f32 %v936_v57, %v936_v57 }
 0x8f3   :  { %v946_v3 = vmul.f32 0.044715, %v943_v58 }
 0x8f4   :  { %v944_v4 = vmul.f32 0.044715, %v941_v59  ;;  %v942_v5 = vmul.f32 %v939_v2, %v936_v57 }
 0x8f5   :  { %v949_v6 = vadd.f32 %v946_v3, %v937_v49 }
 0x8f6   :  { %v947_v10 = vadd.f32 %v944_v4, %v935_v51  ;;  %v945_v11 = vmul.f32 0.044715, %v942_v5 }
 0x8f7   :  { %v952_v12 = vmul.f32 0.7978846, %v949_v6 }
 0x8f8   :  { %v950_v13 = vmul.f32 0.7978846, %v947_v10  ;;  %v948_v14 = vadd.f32 %v945_v11, %v936_v57 }
 0x8f9   :  { %2253 = vtanh.f32 %v952_v12 }
 0x8fa   :  { %v951_v16 = vmul.f32 0.7978846, %v948_v14  ;;  %2255 = vtanh.f32 %v950_v13 }
 0x8fc   :  { %2257 = vtanh.f32 %v951_v16 }
 0x903   :  { %v2254_v17 = vpop.eup %2253 }
 0x904   :  { %v2256_v20 = vpop.eup %2255  ;;  %v958_v21 = vadd.f32 1.0, %v2254_v17 }
 0x905   :  { %v956_v23 = vadd.f32 1.0, %v2256_v20 }
 0x906   :  { %v2258_v24 = vpop.eup %2257  ;;  %v961_v27 = vmul.f32 0.5, %v958_v21 }
 0x907   :  { %v957_v25 = vadd.f32 1.0, %v2258_v24  ;;  %v959_v26 = vmul.f32 0.5, %v956_v23 }
 0x908   :  { %v964_v1 = vmul.f32 %v961_v27, %v937_v49  ;;  %v1161_v27 = vstv %s1947_s14 }
 0x909   :  { %v960_v28 = vmul.f32 0.5, %v957_v25  ;;  %v962_v60 = vmul.f32 %v959_v26, %v935_v51  ;;  %v1157_v26 = vstv %s1948_s15 }
 0x90a   :  { %v966_v30 = vpack.c.bf16 %v964_v1, %v964_v1  ;;  %v1183_v1 = vpop.permute.xlu0 %1182 }
 0x90b   :  { %v963_v0 = vmul.f32 %v960_v28, %v936_v57  ;;  %v1178_v28 = vpop.permute.xlu1 %1177 }
 0x90c   :  { %v968_v31 = vsel %vm225_vm2, %v966_v30, 0 }
 0x90d   :  { %v965_v29 = vpack.c.bf16 %v963_v0, %v962_v60 }
 0x90f   :  { %2129 = vmatprep.subr.bf16.mxu1 %v965_v29 }
 0x910   :  { %2130 = vmatpush3.bf16.msra.mxu1 %v965_v29 }
 0x911   :  { %2215 = vmatprep.subr.msk.bf16.mxu1 %vm225_vm2, %v966_v30 }
 0x914   :  { %2132 = vmatpush3.bf16.msra.mxu1 %v968_v31 }
 0x915   :  { %2145 = vmatprep.subr.bf16.mxu1 %v2499_v61 }
 0x917   :  { %2134 = vmatmul.mubr.msk.bf16.vlgmr.msra.gmra.mrb[16].mxu1 %vm218_vm1, %v2480_v52 }
 0x918   :  { %2146 = vmatpush3.bf16.msra.mxu1 %v2499_v61 }
 0x919   :  { %2147 = vmatprep.subr.bf16.mxu1 %v2506_v62 }
 0x91c   :  { %2148 = vmatpush3.bf16.msra.mxu1 %v2506_v62 }
 0x9ea   :  { %v2135_v32 = vpop.f32.mrb[16].mxu1 }
 0x9eb   :  { %v1004_v33 = vpop.f32.mrb[17].mxu1  ;;  %v1019_v40 = vpack.c.bf16 %v2135_v32, %v2135_v32  ;;  %v1164_v32 = vmul.f32 %v1161_v27, %v2589_v34 }
 0x9ec   :  { %v2136_v36 = vpop.f32.mrb[18].mxu1 }
 0x9ed   :  { %v1007_v37 = vpop.f32.mrb[19].mxu1 }
 0x9ee   :  { %v1018_v39 = vpack.c.bf16 %v1007_v37, %v1004_v33 }
 0x9f0   :  { %2141 = vmatprep.mubr.msk.bf16.mxu0 %vm297_vm3, %v1018_v39 }
 0x9f1   :  { %2142 = vmatmul.mubr.msk.bf16.vlgmr.msra.gmra.mrb[20].mxu0 %vm297_vm3, %v1019_v40 }
 0x9f2   :  { %2154 = vmatpush3.bf16.msra.mxu0 %v2401_v15 }
 0x9f3   :  { %2167 = vmatprep.subr.bf16.mxu0 %v2460_v8 }
 0xac4   :  { %v2143_v41 = vpop.f32.mrb[20].mxu0 }
 0xac5   :  { %v1069_v43 = vadd.f32 %v2143_v41, %v2513_v63  ;;  %v1060_v44 = vpop.f32.mrb[21].mxu0 }
 0xac6   :  { %v1061_v45 = vadd.f32 %v2513_v63, %v1060_v44  ;;  %v2144_v18 = vpop.f32.mrb[22].mxu0 }
 0xac7   :  { %v1076_v19 = vmul.f32 %v1069_v43, %v1069_v43  ;;  %v1063_v22 = vpop.f32.mrb[23].mxu0  ;;  %v1212_v18 = vpop.permute.xlu0 %1211 }
 0xac8   :  { %v1074_v46 = vmul.f32 %v1061_v45, %v1061_v45  ;;  %v1064_v47 = vadd.f32 %v2513_v63, %v1063_v22 }
 0xac9   :  { %v1079_v48 = vmul.f32 %v1076_v19, %v1069_v43 }
 0xaca   :  { %v1077_v49 = vmul.f32 %v1074_v46, %v1061_v45  ;;  %v1075_v50 = vmul.f32 %v1064_v47, %v1064_v47 }
 0xacb   :  { %v1082_v51 = vmul.f32 0.044715, %v1079_v48 }
 0xacc   :  { %v1080_v54 = vmul.f32 0.044715, %v1077_v49  ;;  %v1078_v15 = vmul.f32 %v1075_v50, %v1064_v47 }
 0xacd   :  { %v1085_v55 = vadd.f32 %v1082_v51, %v1069_v43 }
 0xace   :  { %v1083_v56 = vadd.f32 %v1080_v54, %v1061_v45  ;;  %v1081_v57 = vmul.f32 0.044715, %v1078_v15  ;;  %v1222_v54 = vpop.permute.xlu0 %1221 }
 0xacf   :  { %v1088_v58 = vmul.f32 0.7978846, %v1085_v55 }
 0xad0   :  { %v1086_v59 = vmul.f32 0.7978846, %v1083_v56  ;;  %v1084_v2 = vadd.f32 %v1081_v57, %v1064_v47 }
 0xad1   :  { %2259 = vtanh.f32 %v1088_v58 }
 0xad2   :  { %2261 = vtanh.f32 %v1086_v59  ;;  %v1087_v3 = vmul.f32 0.7978846, %v1084_v2 }
 0xad4   :  { %2263 = vtanh.f32 %v1087_v3 }
 0xadb   :  { %v2260_v4 = vpop.eup %2259 }
 0xadc   :  { %v2262_v5 = vpop.eup %2261  ;;  %v1094_v6 = vadd.f32 1.0, %v2260_v4 }
 0xadd   :  { %v1092_v10 = vadd.f32 1.0, %v2262_v5 }
 0xade   :  { %v2264_v11 = vpop.eup %2263  ;;  %v1097_v12 = vmul.f32 0.5, %v1094_v6 }
 0xadf   :  { %v1095_v13 = vmul.f32 0.5, %v1092_v10  ;;  %v1093_v14 = vadd.f32 1.0, %v2264_v11 }
 0xae0   :  { %v1100_v17 = vmul.f32 %v1097_v12, %v1069_v43  ;;  %v1163_v43 = vmul.f32 %v1161_v27, %v2595_v38 }
 0xae1   :  { %v1096_v16 = vmul.f32 0.5, %v1093_v14  ;;  %v1098_v20 = vmul.f32 %v1095_v13, %v1061_v45  ;;  %v1188_v45 = vpop.permute.xlu1 %1187 }
 0xae2   :  { %v1102_v24 = vpack.c.bf16 %v1100_v17, %v1100_v17 }
 0xae3   :  { %v1099_v21 = vmul.f32 %v1096_v16, %v1064_v47 }
 0xae5   :  { %v1101_v23 = vpack.c.bf16 %v1099_v21, %v1098_v20  ;;  %v1217_v55 = vpop.permute.xlu1 %1216 }
 0xae7   :  { %2149 = vmatprep.mubr.msk.bf16.mxu1 %vm297_vm3, %v1101_v23 }
 0xae8   :  { %2150 = vmatmul.mubr.msk.bf16.vlgmr.msra.gmra.mrb[20].mxu1 %vm297_vm3, %v1102_v24 }
 0xae9   :  { %2163 = vmatprep.mubr.msk.bf16.mxu1 %vm218_vm1, %v2453_v7  ;;  %v1162_v7 = vmul.f32 %v1161_v27, %v2592_v35 }
 0xbbb   :  { %v2151_v25 = vpop.f32.mrb[20].mxu1 }
 0xbbc   :  { %v1152_v60 = vadd.f32 %v2151_v25, %v2525_v42  ;;  %v1143_v0 = vpop.f32.mrb[21].mxu1 }
 0xbbd   :  { %v1144_v29 = vadd.f32 %v2525_v42, %v1143_v0  ;;  %v2152_v30 = vpop.f32.mrb[22].mxu1 }
 0xbbe   :  { %v1160_v31 = vmul.f32 %v1157_v26, %v1152_v60  ;;  %v1146_v33 = vpop.f32.mrb[23].mxu1 }
 0xbbf   :  { %v1158_v36 = vmul.f32 %v1157_v26, %v1144_v29  ;;  %v1147_v37 = vadd.f32 %v2525_v42, %v1146_v33 }
 0xbc0   :  { %v1167_v39 = vadd.f32 %v1164_v32, %v1160_v31 }
 0xbc1   :  { %v1165_v40 = vadd.f32 %v1162_v7, %v1158_v36  ;;  %v1159_v41 = vmul.f32 %v1157_v26, %v1147_v37 }
 0xbc2   :  { %v1170_v44 = vsub.f32 %v2589_v34, %v1167_v39 }
 0xbc3   :  { %v1168_v19 = vsub.f32 %v2592_v35, %v1165_v40  ;;  %v1166_v22 = vadd.f32 %v1163_v43, %v1159_v41 }
 0xbc4   :  { %v1192_v46 = vmul.f32 %v1188_v45, %v1170_v44 }
 0xbc5   :  { %v1190_v47 = vmul.f32 %v1178_v28, %v1168_v19  ;;  %v1169_v48 = vsub.f32 %v2595_v38, %v1166_v22 }
 0xbc6   :  { %v2641_v49 = vadd.f32 %v1192_v46, %v2589_v34  ;;  %v2660_v34 = vld [vmem:[%s2774_s4] sm:$0xff]  }
 0xbc7   :  { %v2644_v50 = vadd.f32 %v1190_v47, %v2592_v35  ;;  %v1191_v51 = vmul.f32 %v1183_v1, %v1169_v48  ;;  %v1967_v35 = vld [vmem:[%s2771_s1 + $0x3] ss:$0 sm:$0xff] }
 0xbc8   :  { %v1226_v56 = vmul.f32 %v1222_v54, %v2641_v49 }
 0xbc9   :  { %v2647_v15 = vadd.f32 %v1191_v51, %v2595_v38  ;;  %v1224_v57 = vmul.f32 %v1212_v18, %v2644_v50 }
 0xbca   :  { %v1228_v2 = vpack.c.bf16 %v1226_v56, %v1226_v56 }
 0xbcb   :  { %v1225_v58 = vmul.f32 %v1217_v55, %v2647_v15 }
 0xbcd   :  { %v1227_v59 = vpack.c.bf16 %v1225_v58, %v1224_v57 }
 0xbcf   :  { %2155 = vmatprep.mubr.msk.bf16.mxu0 %vm119_vm0, %v1227_v59 }
 0xbd0   :  { %2156 = vmatmul.mubr.msk.bf16.vlgmr.msra.gmra.mrb[24].mxu0 %vm119_vm0, %v1228_v2 }
 0xbd1   :  { %2168 = vmatpush3.bf16.msra.mxu0 %v2460_v8 }
 0xbd2   :  { %2169 = vmatprep.subr.bf16.mxu0 %v2487_v53 }
 0xbd5   :  { %2170 = vmatpush3.bf16.msra.mxu0 %v2487_v53 }
 0xbd6   :  { %2183 = vmatprep.subr.bf16.mxu0 %v2660_v34 }
 0xca3   :  { %v2157_v38 = vpop.f32.mrb[24].mxu0 }
 0xca4   :  { %v1278_v3 = vadd.f32 %v2157_v38, %v2467_v9  ;;  %v1269_v4 = vpop.f32.mrb[25].mxu0 }
 0xca5   :  { %v1270_v8 = vadd.f32 %v2467_v9, %v1269_v4  ;;  %v2158_v5 = vpop.f32.mrb[26].mxu0 }
 0xca6   :  { %v1289_v6 = vadd.f32 %v1967_v35, %v1278_v3  ;;  %v1272_v53 = vpop.f32.mrb[27].mxu0 }
 0xca7   :  { %v1287_v10 = vadd.f32 %v1967_v35, %v1270_v8  ;;  %v1273_v11 = vadd.f32 %v2467_v9, %v1272_v53 }
 0xca8   :  { %v1292_v12 = vmul.f32 %v1289_v6, %v1289_v6 }
 0xca9   :  { %v1290_v13 = vmul.f32 %v1287_v10, %v1287_v10  ;;  %v1288_v14 = vadd.f32 %v1967_v35, %v1273_v11 }
 0xcaa   :  { %v1295_v16 = vmul.f32 %v1292_v12, %v1289_v6 }
 0xcab   :  { %v1293_v17 = vmul.f32 %v1290_v13, %v1287_v10  ;;  %v1291_v20 = vmul.f32 %v1288_v14, %v1288_v14 }
 0xcac   :  { %v1298_v21 = vmul.f32 0.044715, %v1295_v16 }
 0xcad   :  { %v1296_v23 = vmul.f32 0.044715, %v1293_v17  ;;  %v1294_v24 = vmul.f32 %v1291_v20, %v1288_v14 }
 0xcae   :  { %v1301_v25 = vadd.f32 %v1298_v21, %v1289_v6 }
 0xcaf   :  { %v1299_v26 = vadd.f32 %v1296_v23, %v1287_v10  ;;  %v1297_v27 = vmul.f32 0.044715, %v1294_v24 }
 0xcb0   :  { %v1304_v28 = vmul.f32 0.7978846, %v1301_v25 }
 0xcb1   :  { %v1302_v60 = vmul.f32 0.7978846, %v1299_v26  ;;  %v1300_v0 = vadd.f32 %v1297_v27, %v1288_v14 }
 0xcb2   :  { %2265 = vtanh.f32 %v1304_v28 }
 0xcb3   :  { %v1303_v1 = vmul.f32 0.7978846, %v1300_v0  ;;  %2267 = vtanh.f32 %v1302_v60  ;;  %v2291_v0 = vld [vmem:[%s2776_s6] sm:$0xff]  }
 0xcb5   :  { %2269 = vtanh.f32 %v1303_v1 }
 0xcbc   :  { %v2266_v9 = vpop.eup %2265 }
 0xcbd   :  { %v2268_v29 = vpop.eup %2267  ;;  %v1310_v30 = vadd.f32 1.0, %v2266_v9  ;;  %v1509_v9 = vstv %s1962_s24 }
 0xcbe   :  { %v1308_v31 = vadd.f32 1.0, %v2268_v29  ;;  %v1513_v29 = vstv %s1961_s23 }
 0xcbf   :  { %v2270_v32 = vpop.eup %2269  ;;  %v1313_v7 = vmul.f32 0.5, %v1310_v30  ;;  %v1530_v30 = vpop.permute.xlu1 %1529 }
 0xcc0   :  { %v1309_v33 = vadd.f32 1.0, %v2270_v32  ;;  %v1311_v36 = vmul.f32 0.5, %v1308_v31 }
 0xcc1   :  { %v1316_v41 = vmul.f32 %v1313_v7, %v1289_v6 }
 0xcc2   :  { %v1312_v37 = vmul.f32 0.5, %v1309_v33  ;;  %v1314_v39 = vmul.f32 %v1311_v36, %v1287_v10  ;;  %v1535_v33 = vpop.permute.xlu0 %1534 }
 0xcc3   :  { %v1318_v44 = vpack.c.bf16 %v1316_v41, %v1316_v41 }
 0xcc4   :  { %v1315_v40 = vmul.f32 %v1312_v37, %v1288_v14 }
 0xcc5   :  { %v1320_v45 = vsel %vm225_vm2, %v1318_v44, 0 }
 0xcc6   :  { %v1317_v43 = vpack.c.bf16 %v1315_v40, %v1314_v39  ;;  %v1516_v39 = vmul.f32 %v1513_v29, %v2641_v49 }
 0xcc8   :  { %2159 = vmatprep.subr.bf16.mxu1 %v1317_v43 }
 0xcc9   :  { %2160 = vmatpush3.bf16.msra.mxu1 %v1317_v43  ;;  %v1514_v43 = vmul.f32 %v1513_v29, %v2644_v50 }
 0xcca   :  { %2216 = vmatprep.subr.msk.bf16.mxu1 %vm225_vm2, %v1318_v44 }
 0xccd   :  { %2162 = vmatpush3.bf16.msra.mxu1 %v1320_v45 }
 0xcce   :  { %2175 = vmatprep.subr.bf16.mxu1 %v2499_v61 }
 0xcd0   :  { %2164 = vmatmul.mubr.msk.bf16.vlgmr.msra.gmra.mrb[24].mxu1 %vm218_vm1, %v2480_v52  ;;  %v2683_v52 = vld [vmem:[%s2777_s7] sm:$0xff]  }
 0xcd1   :  { %2176 = vmatpush3.bf16.msra.mxu1 %v2499_v61 }
 0xcd2   :  { %2177 = vmatprep.subr.bf16.mxu1 %v2506_v62 }
 0xcd5   :  { %2178 = vmatpush3.bf16.msra.mxu1 %v2506_v62 }
 0xda3   :  { %v2165_v18 = vpop.f32.mrb[24].mxu1 }
 0xda4   :  { %v1356_v19 = vpop.f32.mrb[25].mxu1  ;;  %v1371_v48 = vpack.c.bf16 %v2165_v18, %v2165_v18 }
 0xda5   :  { %v2166_v22 = vpop.f32.mrb[26].mxu1 }
 0xda6   :  { %v1359_v46 = vpop.f32.mrb[27].mxu1  ;;  %v1515_v22 = vmul.f32 %v1513_v29, %v2647_v15 }
 0xda7   :  { %v1370_v47 = vpack.c.bf16 %v1359_v46, %v1356_v19 }
 0xda9   :  { %2171 = vmatprep.mubr.msk.bf16.mxu0 %vm297_vm3, %v1370_v47  ;;  %v1540_v47 = vpop.permute.xlu1 %1539 }
 0xdaa   :  { %2172 = vmatmul.mubr.msk.bf16.vlgmr.msra.gmra.mrb[28].mxu0 %vm297_vm3, %v1371_v48  ;;  %v1564_v48 = vpop.permute.xlu0 %1563 }
 0xdab   :  { %2184 = vmatpush3.bf16.msra.mxu0 %v2660_v34 }
 0xdac   :  { %2197 = vmatprep.subr.bf16.mxu0 %v2683_v52 }
 0xe7d   :  { %v2173_v61 = vpop.f32.mrb[28].mxu0 }
 0xe7e   :  { %v1421_v62 = vadd.f32 %v2173_v61, %v2513_v63  ;;  %v1412_v51 = vpop.f32.mrb[29].mxu0 }
 0xe7f   :  { %v1413_v54 = vadd.f32 %v2513_v63, %v1412_v51  ;;  %v2174_v55 = vpop.f32.mrb[30].mxu0 }
 0xe80   :  { %v1428_v56 = vmul.f32 %v1421_v62, %v1421_v62  ;;  %v1415_v57 = vpop.f32.mrb[31].mxu0 }
 0xe81   :  { %v1426_v58 = vmul.f32 %v1413_v54, %v1413_v54  ;;  %v1416_v59 = vadd.f32 %v2513_v63, %v1415_v57 }
 0xe82   :  { %v1431_v2 = vmul.f32 %v1428_v56, %v1421_v62 }
 0xe83   :  { %v1429_v34 = vmul.f32 %v1426_v58, %v1413_v54  ;;  %v1427_v35 = vmul.f32 %v1416_v59, %v1416_v59  ;;  %v1574_v58 = vpop.permute.xlu0 %1573 }
 0xe84   :  { %v1434_v38 = vmul.f32 0.044715, %v1431_v2  ;;  %v1569_v2 = vpop.permute.xlu1 %1568 }
 0xe85   :  { %v1432_v3 = vmul.f32 0.044715, %v1429_v34  ;;  %v1430_v4 = vmul.f32 %v1427_v35, %v1416_v59 }
 0xe86   :  { %v1437_v8 = vadd.f32 %v1434_v38, %v1421_v62 }
 0xe87   :  { %v1435_v5 = vadd.f32 %v1432_v3, %v1413_v54  ;;  %v1433_v6 = vmul.f32 0.044715, %v1430_v4 }
 0xe88   :  { %v1440_v53 = vmul.f32 0.7978846, %v1437_v8  ;;  %v2293_v8 = vld [vmem:[%s2775_s5] ss:$0 sm:$0xff] }
 0xe89   :  { %v1438_v10 = vmul.f32 0.7978846, %v1435_v5  ;;  %v1436_v11 = vadd.f32 %v1433_v6, %v1416_v59 }
 0xe8a   :  { %2271 = vtanh.f32 %v1440_v53 }
 0xe8b   :  { %2273 = vtanh.f32 %v1438_v10  ;;  %v1439_v12 = vmul.f32 0.7978846, %v1436_v11 }
 0xe8d   :  { %2275 = vtanh.f32 %v1439_v12 }
 0xe94   :  { %v2272_v13 = vpop.eup %2271 }
 0xe95   :  { %v2274_v14 = vpop.eup %2273  ;;  %v1446_v16 = vadd.f32 1.0, %v2272_v13 }
 0xe96   :  { %v1444_v63 = vadd.f32 1.0, %v2274_v14 }
 0xe97   :  { %v2276_v17 = vpop.eup %2275  ;;  %v1449_v20 = vmul.f32 0.5, %v1446_v16 }
 0xe98   :  { %v1447_v21 = vmul.f32 0.5, %v1444_v63  ;;  %v1445_v23 = vadd.f32 1.0, %v2276_v17 }
 0xe99   :  { %v1452_v25 = vmul.f32 %v1449_v20, %v1421_v62 }
 0xe9a   :  { %v1448_v24 = vmul.f32 0.5, %v1445_v23  ;;  %v1450_v26 = vmul.f32 %v1447_v21, %v1413_v54 }
 0xe9b   :  { %v1454_v60 = vpack.c.bf16 %v1452_v25, %v1452_v25 }
 0xe9c   :  { %v1451_v27 = vmul.f32 %v1448_v24, %v1416_v59 }
 0xe9e   :  { %v1453_v28 = vpack.c.bf16 %v1451_v27, %v1450_v26 }
 0xea0   :  { %2179 = vmatprep.mubr.msk.bf16.mxu1 %vm297_vm3, %v1453_v28 }
 0xea1   :  { %2180 = vmatmul.mubr.msk.bf16.vlgmr.msra.gmra.mrb[28].mxu1 %vm297_vm3, %v1454_v60 }
 0xea2   :  { %2193 = vmatprep.mubr.msk.bf16.mxu1 %vm218_vm1, %v2291_v0 }
 0xf74   :  { %v2181_v1 = vpop.f32.mrb[28].mxu1 }
 0xf75   :  { %v1504_v31 = vadd.f32 %v2181_v1, %v2525_v42  ;;  %v1495_v32 = vpop.f32.mrb[29].mxu1 }
 0xf76   :  { %v1496_v36 = vadd.f32 %v2525_v42, %v1495_v32  ;;  %v2182_v7 = vpop.f32.mrb[30].mxu1 }
 0xf77   :  { %v1512_v37 = vmul.f32 %v1509_v9, %v1504_v31  ;;  %v1498_v40 = vpop.f32.mrb[31].mxu1 }
 0xf78   :  { %v1510_v41 = vmul.f32 %v1509_v9, %v1496_v36  ;;  %v1499_v44 = vadd.f32 %v2525_v42, %v1498_v40 }
 0xf79   :  { %v1519_v45 = vadd.f32 %v1516_v39, %v1512_v37 }
 0xf7a   :  { %v1517_v18 = vadd.f32 %v1514_v43, %v1510_v41  ;;  %v1511_v19 = vmul.f32 %v1509_v9, %v1499_v44 }
 0xf7b   :  { %v1522_v46 = vsub.f32 %v2641_v49, %v1519_v45 }
 0xf7c   :  { %v1520_v61 = vsub.f32 %v2644_v50, %v1517_v18  ;;  %v1518_v62 = vadd.f32 %v1515_v22, %v1511_v19  ;;  %v2294_v19 = vld [vmem:[%s2779_s9] sm:$0xff]   ;;  %v2295_v22 = vld [vmem:[%s2776_s6 + $0x8] ss:$0 sps:$4 sm:$0x33]  }
 0xf7d   :  { %v1544_v51 = vmul.f32 %v1540_v47, %v1522_v46  ;;  %v2296_v46 = vld [vmem:[%s2779_s9 + $0x8] sm:$0xff]   ;;  %s1976_s9 = sld [smem:[#allocation2 + $0x12]] }
 0xf7e   :  { %v1542_v54 = vmul.f32 %v1530_v30, %v1520_v61  ;;  %v1521_v55 = vsub.f32 %v2647_v15, %v1518_v62 }
 0xf7f   :  { %v2705_v56 = vadd.f32 %v1544_v51, %v2641_v49  ;;  %v2292_v49 = vld [vmem:[%s2777_s7 + $0x8] sm:$0xff]  }
 0xf80   :  { %v2708_v42 = vadd.f32 %v1542_v54, %v2644_v50  ;;  %v1543_v57 = vmul.f32 %v1535_v33, %v1521_v55  ;;  %v1981_v50 = vld [vmem:[%s2771_s1 + $0x4] ss:$0 sm:$0xff] }
 0xf81   :  { %v1578_v34 = vmul.f32 %v1574_v58, %v2705_v56 }
 0xf82   :  { %v2711_v59 = vadd.f32 %v1543_v57, %v2647_v15  ;;  %v1576_v35 = vmul.f32 %v1564_v48, %v2708_v42  ;;  %v2297_v57 = vld [vmem:[%s2778_s8] ss:$0 sm:$0xff]  ;;  %s1975_s8 = sld [smem:[#allocation2 + $0x11]] }
 0xf83   :  { %v1580_v4 = vpack.c.bf16 %v1578_v34, %v1578_v34 }
 0xf84   :  { %v1577_v38 = vmul.f32 %v1569_v2, %v2711_v59 }
 0xf86   :  { %v1579_v3 = vpack.c.bf16 %v1577_v38, %v1576_v35 }
 0xf88   :  { %2185 = vmatprep.mubr.msk.bf16.mxu0 %vm119_vm0, %v1579_v3 }
 0xf89   :  { %2186 = vmatmul.mubr.msk.bf16.vlgmr.msra.gmra.mrb[32].mxu0 %vm119_vm0, %v1580_v4 }
 0xf8a   :  { %2198 = vmatpush3.bf16.msra.mxu0 %v2683_v52 }
 0xf8b   :  { %2199 = vmatprep.subr.bf16.mxu0 %v2292_v49 }
 0xf8e   :  { %2200 = vmatpush3.bf16.msra.mxu0 %v2292_v49 }
0x105c   :  { %v2187_v15 = vpop.f32.mrb[32].mxu0 }
0x105d   :  { %v1630_v5 = vadd.f32 %v2293_v8, %v2187_v15  ;;  %v1621_v6 = vpop.f32.mrb[33].mxu0 }
0x105e   :  { %v1622_v53 = vadd.f32 %v2293_v8, %v1621_v6  ;;  %v2188_v10 = vpop.f32.mrb[34].mxu0 }
0x105f   :  { %v1641_v52 = vadd.f32 %v1981_v50, %v1630_v5  ;;  %v1624_v11 = vpop.f32.mrb[35].mxu0 }
0x1060   :  { %v1639_v12 = vadd.f32 %v1981_v50, %v1622_v53  ;;  %v1625_v13 = vadd.f32 %v2293_v8, %v1624_v11 }
0x1061   :  { %v1644_v14 = vmul.f32 %v1641_v52, %v1641_v52 }
0x1062   :  { %v1642_v16 = vmul.f32 %v1639_v12, %v1639_v12  ;;  %v1640_v63 = vadd.f32 %v1981_v50, %v1625_v13 }
0x1063   :  { %v1647_v17 = vmul.f32 %v1644_v14, %v1641_v52 }
0x1064   :  { %v1645_v20 = vmul.f32 %v1642_v16, %v1639_v12  ;;  %v1643_v21 = vmul.f32 %v1640_v63, %v1640_v63 }
0x1065   :  { %v1650_v23 = vmul.f32 0.044715, %v1647_v17 }
0x1066   :  { %v1648_v24 = vmul.f32 0.044715, %v1645_v20  ;;  %v1646_v25 = vmul.f32 %v1643_v21, %v1640_v63 }
0x1067   :  { %v1653_v26 = vadd.f32 %v1650_v23, %v1641_v52 }
0x1068   :  { %v1651_v27 = vadd.f32 %v1648_v24, %v1639_v12  ;;  %v1649_v28 = vmul.f32 0.044715, %v1646_v25 }
0x1069   :  { %v1656_v60 = vmul.f32 0.7978846, %v1653_v26 }
0x106a   :  { %v1654_v0 = vmul.f32 0.7978846, %v1651_v27  ;;  %v1652_v1 = vadd.f32 %v1649_v28, %v1640_v63 }
0x106b   :  { %2277 = vtanh.f32 %v1656_v60 }
0x106c   :  { %v1655_v9 = vmul.f32 0.7978846, %v1652_v1  ;;  %2279 = vtanh.f32 %v1654_v0 }
0x106e   :  { %2281 = vtanh.f32 %v1655_v9 }
0x1075   :  { %v2278_v29 = vpop.eup %2277 }
0x1076   :  { %v2280_v30 = vpop.eup %2279  ;;  %v1662_v31 = vadd.f32 1.0, %v2278_v29 }
0x1077   :  { %v1660_v32 = vadd.f32 1.0, %v2280_v30  ;;  %v1861_v30 = vstv %s1976_s9 }
0x1078   :  { %v2282_v33 = vpop.eup %2281  ;;  %v1665_v37 = vmul.f32 0.5, %v1662_v31  ;;  %v1865_v31 = vstv %s1975_s8 }
0x1079   :  { %v1661_v36 = vadd.f32 1.0, %v2282_v33  ;;  %v1663_v7 = vmul.f32 0.5, %v1660_v32  ;;  %v2298_v32 = vld [vmem:[%s2780_s10] ss:$0 sm:$0xff] }
0x107a   :  { %v1668_v43 = vmul.f32 %v1665_v37, %v1641_v52 }
0x107b   :  { %v1664_v39 = vmul.f32 0.5, %v1661_v36  ;;  %v1666_v40 = vmul.f32 %v1663_v7, %v1639_v12  ;;  %v1882_v7 = vpop.permute.xlu1 %1881 }
0x107c   :  { %v1670_v45 = vpack.c.bf16 %v1668_v43, %v1668_v43 }
0x107d   :  { %v1667_v41 = vmul.f32 %v1664_v39, %v1640_v63 }
0x107e   :  { %v1672_v18 = vsel %vm225_vm2, %v1670_v45, 0 }
0x107f   :  { %v1669_v44 = vpack.c.bf16 %v1667_v41, %v1666_v40  ;;  %v1868_v41 = vmul.f32 %v1865_v31, %v2705_v56 }
0x1081   :  { %2189 = vmatprep.subr.bf16.mxu1 %v1669_v44 }
0x1082   :  { %2190 = vmatpush3.bf16.msra.mxu1 %v1669_v44 }
0x1083   :  { %2217 = vmatprep.subr.msk.bf16.mxu1 %vm225_vm2, %v1670_v45  ;;  %v1866_v45 = vmul.f32 %v1865_v31, %v2708_v42 }
0x1086   :  { %2192 = vmatpush3.bf16.msra.mxu1 %v1672_v18 }
0x1087   :  { %2205 = vmatprep.subr.bf16.mxu1 %v2294_v19 }
0x1089   :  { %2194 = vmatmul.mubr.msk.bf16.vlgmr.msra.gmra.mrb[32].mxu1 %vm218_vm1, %v2295_v22 }
0x108a   :  { %2206 = vmatpush3.bf16.msra.mxu1 %v2294_v19 }
0x108b   :  { %2207 = vmatprep.subr.bf16.mxu1 %v2296_v46 }
0x108e   :  { %2208 = vmatpush3.bf16.msra.mxu1 %v2296_v46 }
0x115c   :  { %v2195_v47 = vpop.f32.mrb[32].mxu1 }
0x115d   :  { %v1708_v48 = vpop.f32.mrb[33].mxu1  ;;  %v1723_v54 = vpack.c.bf16 %v2195_v47, %v2195_v47  ;;  %v1867_v47 = vmul.f32 %v1865_v31, %v2711_v59 }
0x115e   :  { %v2196_v61 = vpop.f32.mrb[34].mxu1 }
0x115f   :  { %v1711_v62 = vpop.f32.mrb[35].mxu1  ;;  %v1892_v61 = vpop.permute.xlu1 %1891 }
0x1160   :  { %v1722_v51 = vpack.c.bf16 %v1711_v62, %v1708_v48 }
0x1162   :  { %2201 = vmatprep.mubr.msk.bf16.mxu0 %vm297_vm3, %v1722_v51 }
0x1163   :  { %2202 = vmatmul.mubr.msk.bf16.vlgmr.msra.gmra.mrb[36].mxu0 %vm297_vm3, %v1723_v54 }
0x1236   :  { %v2203_v55 = vpop.f32.mrb[36].mxu0 }
0x1237   :  { %v1773_v58 = vadd.f32 %v2297_v57, %v2203_v55  ;;  %v1764_v2 = vpop.f32.mrb[37].mxu0 }
0x1238   :  { %v1765_v34 = vadd.f32 %v2297_v57, %v1764_v2  ;;  %v2204_v35 = vpop.f32.mrb[38].mxu0 }
0x1239   :  { %v1780_v38 = vmul.f32 %v1773_v58, %v1773_v58  ;;  %v1767_v3 = vpop.f32.mrb[39].mxu0 }
0x123a   :  { %v1778_v4 = vmul.f32 %v1765_v34, %v1765_v34  ;;  %v1768_v49 = vadd.f32 %v2297_v57, %v1767_v3 }
0x123b   :  { %v1783_v50 = vmul.f32 %v1780_v38, %v1773_v58 }
0x123c   :  { %v1781_v15 = vmul.f32 %v1778_v4, %v1765_v34  ;;  %v1779_v8 = vmul.f32 %v1768_v49, %v1768_v49 }
0x123d   :  { %v1786_v5 = vmul.f32 0.044715, %v1783_v50 }
0x123e   :  { %v1784_v6 = vmul.f32 0.044715, %v1781_v15  ;;  %v1782_v53 = vmul.f32 %v1779_v8, %v1768_v49 }
0x123f   :  { %v1789_v10 = vadd.f32 %v1786_v5, %v1773_v58 }
0x1240   :  { %v1787_v52 = vadd.f32 %v1784_v6, %v1765_v34  ;;  %v1785_v11 = vmul.f32 0.044715, %v1782_v53 }
0x1241   :  { %v1792_v12 = vmul.f32 0.7978846, %v1789_v10 }
0x1242   :  { %v1790_v13 = vmul.f32 0.7978846, %v1787_v52  ;;  %v1788_v14 = vadd.f32 %v1785_v11, %v1768_v49 }
0x1243   :  { %2283 = vtanh.f32 %v1792_v12 }
0x1244   :  { %2285 = vtanh.f32 %v1790_v13  ;;  %v1791_v16 = vmul.f32 0.7978846, %v1788_v14 }
0x1246   :  { %2287 = vtanh.f32 %v1791_v16 }
0x124d   :  { %v2284_v63 = vpop.eup %2283 }
0x124e   :  { %v2286_v17 = vpop.eup %2285  ;;  %v1798_v20 = vadd.f32 1.0, %v2284_v63 }
0x124f   :  { %v1796_v21 = vadd.f32 1.0, %v2286_v17 }
0x1250   :  { %v2288_v23 = vpop.eup %2287  ;;  %v1801_v24 = vmul.f32 0.5, %v1798_v20 }
0x1251   :  { %v1799_v25 = vmul.f32 0.5, %v1796_v21  ;;  %v1797_v26 = vadd.f32 1.0, %v2288_v23 }
0x1252   :  { %v1804_v28 = vmul.f32 %v1801_v24, %v1773_v58  ;;  %v1887_v58 = vpop.permute.xlu0 %1886 }
0x1253   :  { %v1800_v27 = vmul.f32 0.5, %v1797_v26  ;;  %v1802_v60 = vmul.f32 %v1799_v25, %v1765_v34 }
0x1254   :  { %v1806_v9 = vpack.c.bf16 %v1804_v28, %v1804_v28 }
0x1255   :  { %v1803_v0 = vmul.f32 %v1800_v27, %v1768_v49 }
0x1257   :  { %v1805_v1 = vpack.c.bf16 %v1803_v0, %v1802_v60 }
0x1259   :  { %2209 = vmatprep.mubr.msk.bf16.mxu1 %vm297_vm3, %v1805_v1 }
0x125a   :  { %2210 = vmatmul.mubr.msk.bf16.vlgmr.msra.gmra.mrb[36].mxu1 %vm297_vm3, %v1806_v9 }
0x132d   :  { %v2211_v29 = vpop.f32.mrb[36].mxu1 }
0x132e   :  { %v1856_v33 = vadd.f32 %v2298_v32, %v2211_v29  ;;  %v1847_v36 = vpop.f32.mrb[37].mxu1 }
0x132f   :  { %v1848_v37 = vadd.f32 %v2298_v32, %v1847_v36  ;;  %v2212_v39 = vpop.f32.mrb[38].mxu1 }
0x1330   :  { %v1864_v40 = vmul.f32 %v1861_v30, %v1856_v33  ;;  %v1850_v43 = vpop.f32.mrb[39].mxu1 }
0x1331   :  { %v1862_v44 = vmul.f32 %v1861_v30, %v1848_v37  ;;  %v1851_v18 = vadd.f32 %v2298_v32, %v1850_v43 }
0x1332   :  { %v1871_v19 = vadd.f32 %v1868_v41, %v1864_v40 }
0x1333   :  { %v1869_v22 = vadd.f32 %v1866_v45, %v1862_v44  ;;  %v1863_v46 = vmul.f32 %v1861_v30, %v1851_v18 }
0x1334   :  { %v1874_v48 = vsub.f32 %v2705_v56, %v1871_v19 }
0x1335   :  { %v1872_v62 = vsub.f32 %v2708_v42, %v1869_v22  ;;  %v1870_v51 = vadd.f32 %v1867_v47, %v1863_v46 }
0x1336   :  { %v1896_v54 = vmul.f32 %v1892_v61, %v1874_v48 }
0x1337   :  { %v1894_v55 = vmul.f32 %v1882_v7, %v1872_v62  ;;  %v1873_v57 = vsub.f32 %v2711_v59, %v1870_v51 }
0x1338   :  { %v1899_v2 = vadd.f32 %v1896_v54, %v2705_v56 }
0x1339   :  { %v1897_v34 = vadd.f32 %v1894_v55, %v2708_v42  ;;  %v1895_v35 = vmul.f32 %v1887_v58, %v1873_v57 }
0x133a   :  { %1903 = vst.msk [vmem:[%s2781_s11 + $0x10] sm:$0xf] %vm1902_vm4, %v1899_v2 }
0x133b   :  { %1900 = vst.msk [vmem:[%s2781_s11] sm:$0xff] %vm119_vm0, %v1897_v34  ;;  %v1898_v38 = vadd.f32 %v1895_v35, %v2711_v59 }
0x133d   :  { %1901 = vst.msk [vmem:[%s2781_s11 + $0x8] sm:$0xff] %vm119_vm0, %v1898_v38 }
0x133e   :  { %1908 = vsyncpa [#allocation3], 1 }

</bundles_post_ra>
